<compile_context>
chip_gen: v6e
topology: v6e:2x2x1
jax: 0.10.0
libtpu: 0.0.40
codegen_flags: <defaults>
</compile_context>

<pallas_src>
from functools import partial

import jax
import jax.numpy as jnp
from jax.experimental import pallas as pl
from jax.experimental.pallas import tpu as pltpu


_VMEM_LIMIT_BYTES = 32 * 1024 * 1024  # explicit, safe on v5e/v6e/v7x


# ----------------------------------------------------------------------------
# Kernel 1: lane-dense conv matmul
#   out[c, m] = sum_k w[c, k] * rows[k, m]  (+ bias, LeakyReLU, residual)
# ----------------------------------------------------------------------------
def _convT_kernel(*refs, alpha, has_residual, compute_dtype):
    if has_residual:
        w_ref, rows_ref, b_ref, res_ref, o_ref = refs
    else:
        w_ref, rows_ref, b_ref, o_ref = refs
        res_ref = None
    y = jnp.dot(w_ref[...].astype(compute_dtype),
                rows_ref[...].astype(compute_dtype),
                preferred_element_type=jnp.float32)
    y = y + b_ref[...]                       # (Cout, TM) + (Cout, 1), f32
    if alpha is not None:
        y = jnp.where(y > 0, y, alpha * y)   # LeakyReLU in f32 (v5e-safe epilogue)
    if has_residual:
        y = y + res_ref[...].astype(jnp.float32)
    o_ref[...] = y.astype(o_ref.dtype)


def convT_matmul(w_t, rows_t, b, *, alpha=None, residual_t=None,
                 tm=512, compute_dtype=jnp.float32):
    """w_t: (Cout, K), rows_t: (K, M), b: (Cout,) -> (Cout, M) f32."""
    Cout, K = w_t.shape
    K2, M = rows_t.shape
    assert K == K2
    tm = min(tm, M)
    assert tm == M or tm % 128 == 0, "lane tile must be full extent or 128-multiple"
    b2 = b.reshape(Cout, 1)
    has_residual = residual_t is not None

    in_specs = [
        pl.BlockSpec((Cout, K), lambda i: (0, 0)),   # weights resident
        pl.BlockSpec((K, tm), lambda i: (0, i)),     # rows tile (lane axis)
        pl.BlockSpec((Cout, 1), lambda i: (0, 0)),   # bias resident
    ]
    args = [w_t, rows_t, b2]
    if has_residual:
        in_specs.append(pl.BlockSpec((Cout, tm), lambda i: (0, i)))
        args.append(residual_t)

    bytes_accessed = 4 * (Cout * K + K * M + Cout * M)
    if has_residual:
        bytes_accessed += 4 * Cout * M

    return pl.pallas_call(
        partial(_convT_kernel, alpha=alpha, has_residual=has_residual,
                compute_dtype=compute_dtype),
        out_shape=jax.ShapeDtypeStruct((Cout, M), jnp.float32),
        grid=(pl.cdiv(M, tm),),
        in_specs=in_specs,
        out_specs=pl.BlockSpec((Cout, tm), lambda i: (0, i)),
        compiler_params=pltpu.CompilerParams(
            dimension_semantics=("parallel",),
            vmem_limit_bytes=_VMEM_LIMIT_BYTES),
        cost_estimate=pl.CostEstimate(
            flops=2 * Cout * K * M, transcendentals=0,
            bytes_accessed=bytes_accessed),
    )(*args)


# ----------------------------------------------------------------------------
# Kernel 2: fused MLP chain (N linears + activations in ONE pallas_call)
# ----------------------------------------------------------------------------
def _mlp_kernel(*refs, acts, compute_dtype):
    x_ref = refs[0]
    o_ref = refs[-1]
    h = x_ref[...].astype(jnp.float32)
    for l, a in enumerate(acts):
        w = refs[1 + 2 * l][...]
        bias = refs[2 + 2 * l][...]
        y = jnp.dot(h.astype(compute_dtype), w.astype(compute_dtype),
                    preferred_element_type=jnp.float32)
        y = y + bias                          # (TB, N) + (1, N), f32
        if a is not None:                     # a == 0.0 -> ReLU, a == 0.2 -> LeakyReLU
            y = jnp.where(y > 0, y, a * y)
        h = y
    o_ref[...] = h.astype(o_ref.dtype)


def fused_mlp(x, layers, *, tb=256, compute_dtype=jnp.float32):
    """layers: list of (w (K,N), b (N,), act) with act None or a leaky slope."""
    B, K0 = x.shape
    tb = min(tb, B)
    if tb != B and tb % 8 != 0:
        tb = max(8, (tb // 8) * 8)
    acts = tuple(a for (_, _, a) in layers)
    N_last = layers[-1][0].shape[1]

    args = [x]
    in_specs = [pl.BlockSpec((tb, K0), lambda i: (i, 0))]
    for (w, b, _) in layers:
        Kl, Nl = w.shape
        args += [w, b.reshape(1, Nl)]
        in_specs += [pl.BlockSpec((Kl, Nl), lambda i: (0, 0)),
                     pl.BlockSpec((1, Nl), lambda i: (0, 0))]

    return pl.pallas_call(
        partial(_mlp_kernel, acts=acts, compute_dtype=compute_dtype),
        out_shape=jax.ShapeDtypeStruct((B, N_last), x.dtype),
        grid=(pl.cdiv(B, tb),),
        in_specs=in_specs,
        out_specs=pl.BlockSpec((tb, N_last), lambda i: (i, 0)),
        compiler_params=pltpu.CompilerParams(
            dimension_semantics=("parallel",),
            vmem_limit_bytes=_VMEM_LIMIT_BYTES),
    )(*args)


# ----------------------------------------------------------------------------
# Conv2d(k=4, s=2, p=1) via channels-major im2col (glue) + lane-dense matmul
# ----------------------------------------------------------------------------
def _im2col_T(x_cbhw, k=4, s=2, p=1):
    """x in (C, B, H, W) -> rows_T (C*k*k, B*Ho*Wo), K ordered as (Cin, kh, kw)."""
    C, B, H, W = x_cbhw.shape
    xp = jnp.pad(x_cbhw, ((0, 0), (0, 0), (p, p), (p, p)))
    Ho = (H + 2 * p - k) // s + 1
    Wo = (W + 2 * p - k) // s + 1
    patches = [xp[:, :, i:i + Ho * s:s, j:j + Wo * s:s]
               for i in range(k) for j in range(k)]           # each (C, B, Ho, Wo)
    pat = jnp.stack(patches, axis=1)                          # (C, k*k, B, Ho, Wo)
    rows_t = pat.reshape(C * k * k, B * Ho * Wo)
    return rows_t, Ho, Wo


def conv4x4_s2_p1(x_cbhw, w_oihw, b, *, alpha=None, residual_t=None,
                  compute_dtype=jnp.float32):
    """PyTorch-equivalent Conv2d(Cin, Cout, 4, 2, 1) on channels-major input."""
    Cout, Cin, kh, kw = w_oihw.shape
    C, B, H, W = x_cbhw.shape
    assert C == Cin
    rows_t, Ho, Wo = _im2col_T(x_cbhw)
    w_t = w_oihw.reshape(Cout, Cin * kh * kw)   # (Cout, K), K order = (Cin, kh, kw)
    out_t = convT_matmul(w_t, rows_t, b, alpha=alpha, residual_t=residual_t,
                         compute_dtype=compute_dtype)          # (Cout, B*Ho*Wo)
    return out_t.reshape(Cout, B, Ho, Wo)


# ----------------------------------------------------------------------------
# DeterministicPolicy forward
# ----------------------------------------------------------------------------
def deterministic_policy_forward(params, state_images, states, *,
                                 n_inputs, height, width,
                                 compute_dtype=jnp.float32):
    bsize = state_images.shape[0]

    # --- encoder.f_encoder (conv -> LReLU -> conv -> LReLU -> conv) ----------
    x = state_images.reshape(bsize, n_inputs * 3, height, width)   # NCHW
    x_t = jnp.transpose(x, (1, 0, 2, 3))                           # (C, B, H, W)

    h = conv4x4_s2_p1(x_t, params["cw1"], params["cb1"], alpha=0.2,
                      compute_dtype=compute_dtype)
    h = conv4x4_s2_p1(h, params["cw2"], params["cb2"], alpha=0.2,
                      compute_dtype=compute_dtype)

    # --- encoder.s_encoder: 3 linears fused into ONE kernel ------------------
    s = states.reshape(bsize, -1)
    s = fused_mlp(s, [(params["sw1"], params["sb1"], 0.2),
                      (params["sw2"], params["sb2"], 0.2),
                      (params["sw3"], params["sb3"], None)],
                  compute_dtype=compute_dtype)                     # (B, hidden_size)

    # arrange s into the conv-3 output layout (C3, B*Ho3*Wo3) so the residual
    # add `h + s.view(h.size())` runs inside the conv-3 epilogue
    Cout3 = params["cw3"].shape[0]
    _, _, H2, W2 = h.shape
    Ho3, Wo3 = H2 // 2, W2 // 2
    s_t = (s.reshape(bsize, Cout3, Ho3, Wo3)
             .transpose(1, 0, 2, 3)
             .reshape(Cout3, bsize * Ho3 * Wo3))

    h = conv4x4_s2_p1(h, params["cw3"], params["cb3"], alpha=None,
                      residual_t=s_t, compute_dtype=compute_dtype)  # (C3, B, Ho3, Wo3)

    # flatten exactly like PyTorch's NCHW .view(bsize, hsize)
    h_flat = jnp.transpose(h, (1, 0, 2, 3)).reshape(bsize, -1)

    # --- proj + fc head: 5 linears fused into ONE kernel ---------------------
    out = fused_mlp(h_flat,
                    [(params["pw"],  params["pb"],  None),   # proj (no activation)
                     (params["fw1"], params["fb1"], 0.0),    # ReLU
                     (params["fw2"], params["fb2"], 0.0),    # ReLU
                     (params["fw3"], params["fb3"], 0.0),    # ReLU
                     (params["fw4"], params["fb4"], None)],  # final Linear
                    compute_dtype=compute_dtype)
    return out                                               # (B, n_outputs)


# ----------------------------------------------------------------------------
# Deterministic parameter construction (PyTorch layouts; Linear stored as (in, out))
# ----------------------------------------------------------------------------
def make_params(key, *, n_inputs, nfeature, hidden_size, state_input_size,
                n_hidden, n_outputs):
    fm = (nfeature // 4, nfeature // 2, nfeature)
    enc_hidden = fm[-1]
    keys = jax.random.split(key, 22)
    it = iter(keys)

    def rnd(shape):
        return jax.random.normal(next(it), shape, jnp.float32) * 0.05

    hsize = hidden_size  # == nfeature * h_height * h_width
    return {
        # f_encoder conv weights (Cout, Cin, kh, kw)
        "cw1": rnd((fm[0], 3 * n_inputs, 4, 4)), "cb1": rnd((fm[0],)),
        "cw2": rnd((fm[1], fm[0], 4, 4)),        "cb2": rnd((fm[1],)),
        "cw3": rnd((fm[2], fm[1], 4, 4)),        "cb3": rnd((fm[2],)),
        # s_encoder
        "sw1": rnd((state_input_size * n_inputs, enc_hidden)), "sb1": rnd((enc_hidden,)),
        "sw2": rnd((enc_hidden, enc_hidden)),                  "sb2": rnd((enc_hidden,)),
        "sw3": rnd((enc_hidden, hidden_size)),                 "sb3": rnd((hidden_size,)),
        # proj
        "pw": rnd((hsize, n_hidden)),   "pb": rnd((n_hidden,)),
        # fc
        "fw1": rnd((n_hidden, n_hidden)),  "fb1": rnd((n_hidden,)),
        "fw2": rnd((n_hidden, n_hidden)),  "fb2": rnd((n_hidden,)),
        "fw3": rnd((n_hidden, n_hidden)),  "fb3": rnd((n_hidden,)),
        "fw4": rnd((n_hidden, n_outputs)), "fb4": rnd((n_outputs,)),
    }


if __name__ == "__main__":
    # Small config consistent with the module (opt.layers=3):
    #   ncond (n_inputs)=2, nfeature=32, height=width=16 -> h_height=h_width=2
    #   hsize = hidden_size = nfeature * 2 * 2 = 128 (required by the residual view)
    B = 2
    n_inputs = 2
    nfeature = 32
    height = width = 16
    state_input_size = 4
    n_hidden = 128
    n_outputs = 3                                    # opt.n_actions
    hidden_size = nfeature * (height // 8) * (width // 8)   # 128

    key = jax.random.PRNGKey(0)
    kp, ki, ks = jax.random.split(key, 3)

    params = make_params(
        kp, n_inputs=n_inputs, nfeature=nfeature, hidden_size=hidden_size,
        state_input_size=state_input_size, n_hidden=n_hidden, n_outputs=n_outputs)

    state_images = jax.random.normal(ki, (B, n_inputs, 3, height, width), jnp.float32)
    states = jax.random.normal(ks, (B, n_inputs, state_input_size), jnp.float32)

    fwd = jax.jit(partial(deterministic_policy_forward,
                          n_inputs=n_inputs, height=height, width=width))
    out = fwd(params, state_images, states)
    jax.block_until_ready(out)

    assert out.shape == (B, n_outputs), out.shape
    assert bool(jnp.all(jnp.isfinite(out)))
    print("KERNEL_OK")
</pallas_src>

<mosaic_0001>
module attributes {stable_mosaic.version = 11 : i64} {
  func.func @_convT_kernel(%arg0: i32, %arg1: memref<8x96xf32, #tpu.memory_space<vmem>>, %arg2: memref<96x128xf32, #tpu.memory_space<vmem>>, %arg3: memref<8x1xf32, #tpu.memory_space<vmem>>, %arg4: memref<8x128xf32, #tpu.memory_space<vmem>>) attributes {dimension_semantics = [#tpu.dimension_semantics<parallel>], iteration_bounds = array<i64: 1>, scalar_prefetch = 0 : i64, scratch_operands = 0 : i64, tpu.core_type = #tpu.core_type<tc>, window_params = [{pipeline_mode = #tpu.pipeline_mode<synchronous>, transform_indices = @transform_0, window_bounds = array<i64: 8, 96>}, {transform_indices = @transform_1, window_bounds = array<i64: 96, 128>}, {pipeline_mode = #tpu.pipeline_mode<synchronous>, transform_indices = @transform_2, window_bounds = array<i64: 8, 1>}, {transform_indices = @transform_3, window_bounds = array<i64: 8, 128>}]} {
    %c0 = arith.constant 0 : index
    %c0_0 = arith.constant 0 : index
    %0 = vector.load %arg1[%c0, %c0_0] : memref<8x96xf32, #tpu.memory_space<vmem>>, vector<8x96xf32>
    %c0_1 = arith.constant 0 : index
    %c0_2 = arith.constant 0 : index
    %1 = vector.load %arg2[%c0_1, %c0_2] : memref<96x128xf32, #tpu.memory_space<vmem>>, vector<96x128xf32>
    %cst = arith.constant dense<0.000000e+00> : vector<8x128xf32>
    %2 = tpu.matmul %0, %1, %cst {dimension_numbers = #tpu.dot_dimension_numbers<[1], [0], [0], [1], [0, 0, 1, 1], [], []>} : vector<8x96xf32>, vector<96x128xf32>, vector<8x128xf32> -> vector<8x128xf32>
    %c0_3 = arith.constant 0 : index
    %c0_4 = arith.constant 0 : index
    %3 = vector.load %arg3[%c0_3, %c0_4] : memref<8x1xf32, #tpu.memory_space<vmem>>, vector<8x1xf32>
    %4 = vector.broadcast %3 : vector<8x1xf32> to vector<8x128xf32>
    %5 = arith.addf %2, %4 : vector<8x128xf32>
    %cst_5 = arith.constant 0.000000e+00 : f32
    %6 = vector.broadcast %cst_5 : f32 to vector<8x128xf32>
    %7 = arith.cmpf ogt, %5, %6 : vector<8x128xf32>
    %cst_6 = arith.constant 2.000000e-01 : f32
    %8 = vector.broadcast %cst_6 : f32 to vector<8x128xf32>
    %9 = arith.mulf %8, %5 : vector<8x128xf32>
    %10 = arith.select %7, %5, %9 : vector<8x128xi1>, vector<8x128xf32>
    %c0_7 = arith.constant 0 : index
    %c0_8 = arith.constant 0 : index
    %11 = vector.load %arg4[%c0_7, %c0_8] : memref<8x128xf32, #tpu.memory_space<vmem>>, vector<8x128xf32>
    tpu.vector_store %arg4[%c0_7, %c0_8], %10 {strides = array<i32>} : memref<8x128xf32, #tpu.memory_space<vmem>>, vector<8x128xf32>,
    return
  }
  func.func @transform_0(%arg0: i32) -> (i32, i32) {
    %c0_i32 = arith.constant 0 : i32
    %c0_i32_0 = arith.constant 0 : i32
    %c0_i32_1 = arith.constant 0 : i32
    return %c0_i32, %c0_i32_0 : i32, i32
  }
  func.func @transform_1(%arg0: i32) -> (i32, i32) {
    %c0_i32 = arith.constant 0 : i32
    %c0_i32_0 = arith.constant 0 : i32
    return %c0_i32, %arg0 : i32, i32
  }
  func.func @transform_2(%arg0: i32) -> (i32, i32) {
    %c0_i32 = arith.constant 0 : i32
    %c0_i32_0 = arith.constant 0 : i32
    %c0_i32_1 = arith.constant 0 : i32
    return %c0_i32, %c0_i32_0 : i32, i32
  }
  func.func @transform_3(%arg0: i32) -> (i32, i32) {
    %c0_i32 = arith.constant 0 : i32
    %c0_i32_0 = arith.constant 0 : i32
    return %c0_i32, %arg0 : i32, i32
  }
}

module attributes {stable_mosaic.version = 11 : i64} {
  func.func @_convT_kernel(%arg0: i32, %arg1: memref<16x128xf32, #tpu.memory_space<vmem>>, %arg2: memref<128x32xf32, #tpu.memory_space<vmem>>, %arg3: memref<16x1xf32, #tpu.memory_space<vmem>>, %arg4: memref<16x32xf32, #tpu.memory_space<vmem>>) attributes {dimension_semantics = [#tpu.dimension_semantics<parallel>], iteration_bounds = array<i64: 1>, scalar_prefetch = 0 : i64, scratch_operands = 0 : i64, tpu.core_type = #tpu.core_type<tc>, window_params = [{pipeline_mode = #tpu.pipeline_mode<synchronous>, transform_indices = @transform_0, window_bounds = array<i64: 16, 128>}, {transform_indices = @transform_1, window_bounds = array<i64: 128, 32>}, {pipeline_mode = #tpu.pipeline_mode<synchronous>, transform_indices = @transform_2, window_bounds = array<i64: 16, 1>}, {transform_indices = @transform_3, window_bounds = array<i64: 16, 32>}]} {
    %c0 = arith.constant 0 : index
    %c0_0 = arith.constant 0 : index
    %0 = vector.load %arg1[%c0, %c0_0] : memref<16x128xf32, #tpu.memory_space<vmem>>, vector<16x128xf32>
    %c0_1 = arith.constant 0 : index
    %c0_2 = arith.constant 0 : index
    %1 = vector.load %arg2[%c0_1, %c0_2] : memref<128x32xf32, #tpu.memory_space<vmem>>, vector<128x32xf32>
    %cst = arith.constant dense<0.000000e+00> : vector<16x32xf32>
    %2 = tpu.matmul %0, %1, %cst {dimension_numbers = #tpu.dot_dimension_numbers<[1], [0], [0], [1], [0, 0, 1, 1], [], []>} : vector<16x128xf32>, vector<128x32xf32>, vector<16x32xf32> -> vector<16x32xf32>
    %c0_3 = arith.constant 0 : index
    %c0_4 = arith.constant 0 : index
    %3 = vector.load %arg3[%c0_3, %c0_4] : memref<16x1xf32, #tpu.memory_space<vmem>>, vector<16x1xf32>
    %4 = vector.broadcast %3 : vector<16x1xf32> to vector<16x32xf32>
    %5 = arith.addf %2, %4 : vector<16x32xf32>
    %cst_5 = arith.constant 0.000000e+00 : f32
    %6 = vector.broadcast %cst_5 : f32 to vector<16x32xf32>
    %7 = arith.cmpf ogt, %5, %6 : vector<16x32xf32>
    %cst_6 = arith.constant 2.000000e-01 : f32
    %8 = vector.broadcast %cst_6 : f32 to vector<16x32xf32>
    %9 = arith.mulf %8, %5 : vector<16x32xf32>
    %10 = arith.select %7, %5, %9 : vector<16x32xi1>, vector<16x32xf32>
    %c0_7 = arith.constant 0 : index
    %c0_8 = arith.constant 0 : index
    %11 = vector.load %arg4[%c0_7, %c0_8] : memref<16x32xf32, #tpu.memory_space<vmem>>, vector<16x32xf32>
    tpu.vector_store %arg4[%c0_7, %c0_8], %10 {strides = array<i32>} : memref<16x32xf32, #tpu.memory_space<vmem>>, vector<16x32xf32>,
    return
  }
  func.func @transform_0(%arg0: i32) -> (i32, i32) {
    %c0_i32 = arith.constant 0 : i32
    %c0_i32_0 = arith.constant 0 : i32
    %c0_i32_1 = arith.constant 0 : i32
    return %c0_i32, %c0_i32_0 : i32, i32
  }
  func.func @transform_1(%arg0: i32) -> (i32, i32) {
    %c0_i32 = arith.constant 0 : i32
    %c0_i32_0 = arith.constant 0 : i32
    return %c0_i32, %arg0 : i32, i32
  }
  func.func @transform_2(%arg0: i32) -> (i32, i32) {
    %c0_i32 = arith.constant 0 : i32
    %c0_i32_0 = arith.constant 0 : i32
    %c0_i32_1 = arith.constant 0 : i32
    return %c0_i32, %c0_i32_0 : i32, i32
  }
  func.func @transform_3(%arg0: i32) -> (i32, i32) {
    %c0_i32 = arith.constant 0 : i32
    %c0_i32_0 = arith.constant 0 : i32
    return %c0_i32, %arg0 : i32, i32
  }
}

module attributes {stable_mosaic.version = 11 : i64} {
  func.func @_mlp_kernel(%arg0: i32, %arg1: memref<2x8xf32, #tpu.memory_space<vmem>>, %arg2: memref<8x32xf32, #tpu.memory_space<vmem>>, %arg3: memref<1x32xf32, #tpu.memory_space<vmem>>, %arg4: memref<32x32xf32, #tpu.memory_space<vmem>>, %arg5: memref<1x32xf32, #tpu.memory_space<vmem>>, %arg6: memref<32x128xf32, #tpu.memory_space<vmem>>, %arg7: memref<1x128xf32, #tpu.memory_space<vmem>>, %arg8: memref<2x128xf32, #tpu.memory_space<vmem>>) attributes {dimension_semantics = [#tpu.dimension_semantics<parallel>], iteration_bounds = array<i64: 1>, scalar_prefetch = 0 : i64, scratch_operands = 0 : i64, tpu.core_type = #tpu.core_type<tc>, window_params = [{transform_indices = @transform_0, window_bounds = array<i64: 2, 8>}, {pipeline_mode = #tpu.pipeline_mode<synchronous>, transform_indices = @transform_1, window_bounds = array<i64: 8, 32>}, {pipeline_mode = #tpu.pipeline_mode<synchronous>, transform_indices = @transform_2, window_bounds = array<i64: 1, 32>}, {pipeline_mode = #tpu.pipeline_mode<synchronous>, transform_indices = @transform_3, window_bounds = array<i64: 32, 32>}, {pipeline_mode = #tpu.pipeline_mode<synchronous>, transform_indices = @transform_4, window_bounds = array<i64: 1, 32>}, {pipeline_mode = #tpu.pipeline_mode<synchronous>, transform_indices = @transform_5, window_bounds = array<i64: 32, 128>}, {pipeline_mode = #tpu.pipeline_mode<synchronous>, transform_indices = @transform_6, window_bounds = array<i64: 1, 128>}, {transform_indices = @transform_7, window_bounds = array<i64: 2, 128>}]} {
    %c0 = arith.constant 0 : index
    %c0_0 = arith.constant 0 : index
    %0 = vector.load %arg1[%c0, %c0_0] : memref<2x8xf32, #tpu.memory_space<vmem>>, vector<2x8xf32>
    %c0_1 = arith.constant 0 : index
    %c0_2 = arith.constant 0 : index
    %1 = vector.load %arg2[%c0_1, %c0_2] : memref<8x32xf32, #tpu.memory_space<vmem>>, vector<8x32xf32>
    %c0_3 = arith.constant 0 : index
    %c0_4 = arith.constant 0 : index
    %2 = vector.load %arg3[%c0_3, %c0_4] : memref<1x32xf32, #tpu.memory_space<vmem>>, vector<1x32xf32>
    %cst = arith.constant dense<0.000000e+00> : vector<2x32xf32>
    %3 = tpu.matmul %0, %1, %cst {dimension_numbers = #tpu.dot_dimension_numbers<[1], [0], [0], [1], [0, 0, 1, 1], [], []>} : vector<2x8xf32>, vector<8x32xf32>, vector<2x32xf32> -> vector<2x32xf32>
    %4 = vector.broadcast %2 : vector<1x32xf32> to vector<2x32xf32>
    %5 = arith.addf %3, %4 : vector<2x32xf32>
    %cst_5 = arith.constant 0.000000e+00 : f32
    %6 = vector.broadcast %cst_5 : f32 to vector<2x32xf32>
    %7 = arith.cmpf ogt, %5, %6 : vector<2x32xf32>
    %cst_6 = arith.constant 2.000000e-01 : f32
    %8 = vector.broadcast %cst_6 : f32 to vector<2x32xf32>
    %9 = arith.mulf %8, %5 : vector<2x32xf32>
    %10 = arith.select %7, %5, %9 : vector<2x32xi1>, vector<2x32xf32>
    %c0_7 = arith.constant 0 : index
    %c0_8 = arith.constant 0 : index
    %11 = vector.load %arg4[%c0_7, %c0_8] : memref<32x32xf32, #tpu.memory_space<vmem>>, vector<32x32xf32>
    %c0_9 = arith.constant 0 : index
    %c0_10 = arith.constant 0 : index
    %12 = vector.load %arg5[%c0_9, %c0_10] : memref<1x32xf32, #tpu.memory_space<vmem>>, vector<1x32xf32>
    %cst_11 = arith.constant dense<0.000000e+00> : vector<2x32xf32>
    %13 = tpu.matmul %10, %11, %cst_11 {dimension_numbers = #tpu.dot_dimension_numbers<[1], [0], [0], [1], [0, 0, 1, 1], [], []>} : vector<2x32xf32>, vector<32x32xf32>, vector<2x32xf32> -> vector<2x32xf32>
    %14 = vector.broadcast %12 : vector<1x32xf32> to vector<2x32xf32>
    %15 = arith.addf %13, %14 : vector<2x32xf32>
    %cst_12 = arith.constant 0.000000e+00 : f32
    %16 = vector.broadcast %cst_12 : f32 to vector<2x32xf32>
    %17 = arith.cmpf ogt, %15, %16 : vector<2x32xf32>
    %cst_13 = arith.constant 2.000000e-01 : f32
    %18 = vector.broadcast %cst_13 : f32 to vector<2x32xf32>
    %19 = arith.mulf %18, %15 : vector<2x32xf32>
    %20 = arith.select %17, %15, %19 : vector<2x32xi1>, vector<2x32xf32>
    %c0_14 = arith.constant 0 : index
    %c0_15 = arith.constant 0 : index
    %21 = vector.load %arg6[%c0_14, %c0_15] : memref<32x128xf32, #tpu.memory_space<vmem>>, vector<32x128xf32>
    %c0_16 = arith.constant 0 : index
    %c0_17 = arith.constant 0 : index
    %22 = vector.load %arg7[%c0_16, %c0_17] : memref<1x128xf32, #tpu.memory_space<vmem>>, vector<1x128xf32>
    %cst_18 = arith.constant dense<0.000000e+00> : vector<2x128xf32>
    %23 = tpu.matmul %20, %21, %cst_18 {dimension_numbers = #tpu.dot_dimension_numbers<[1], [0], [0], [1], [0, 0, 1, 1], [], []>} : vector<2x32xf32>, vector<32x128xf32>, vector<2x128xf32> -> vector<2x128xf32>
    %24 = vector.broadcast %22 : vector<1x128xf32> to vector<2x128xf32>
    %25 = arith.addf %23, %24 : vector<2x128xf32>
    %c0_19 = arith.constant 0 : index
    %c0_20 = arith.constant 0 : index
    %26 = vector.load %arg8[%c0_19, %c0_20] : memref<2x128xf32, #tpu.memory_space<vmem>>, vector<2x128xf32>
    tpu.vector_store %arg8[%c0_19, %c0_20], %25 {strides = array<i32>} : memref<2x128xf32, #tpu.memory_space<vmem>>, vector<2x128xf32>,
    return
  }
  func.func @transform_0(%arg0: i32) -> (i32, i32) {
    %c0_i32 = arith.constant 0 : i32
    %c0_i32_0 = arith.constant 0 : i32
    return %arg0, %c0_i32 : i32, i32
  }
  func.func @transform_1(%arg0: i32) -> (i32, i32) {
    %c0_i32 = arith.constant 0 : i32
    %c0_i32_0 = arith.constant 0 : i32
    %c0_i32_1 = arith.constant 0 : i32
    return %c0_i32, %c0_i32_0 : i32, i32
  }
  func.func @transform_2(%arg0: i32) -> (i32, i32) {
    %c0_i32 = arith.constant 0 : i32
    %c0_i32_0 = arith.constant 0 : i32
    %c0_i32_1 = arith.constant 0 : i32
    return %c0_i32, %c0_i32_0 : i32, i32
  }
  func.func @transform_3(%arg0: i32) -> (i32, i32) {
    %c0_i32 = arith.constant 0 : i32
    %c0_i32_0 = arith.constant 0 : i32
    %c0_i32_1 = arith.constant 0 : i32
    return %c0_i32, %c0_i32_0 : i32, i32
  }
  func.func @transform_4(%arg0: i32) -> (i32, i32) {
    %c0_i32 = arith.constant 0 : i32
    %c0_i32_0 = arith.constant 0 : i32
    %c0_i32_1 = arith.constant 0 : i32
    return %c0_i32, %c0_i32_0 : i32, i32
  }
  func.func @transform_5(%arg0: i32) -> (i32, i32) {
    %c0_i32 = arith.constant 0 : i32
    %c0_i32_0 = arith.constant 0 : i32
    %c0_i32_1 = arith.constant 0 : i32
    return %c0_i32, %c0_i32_0 : i32, i32
  }
  func.func @transform_6(%arg0: i32) -> (i32, i32) {
    %c0_i32 = arith.constant 0 : i32
    %c0_i32_0 = arith.constant 0 : i32
    %c0_i32_1 = arith.constant 0 : i32
    return %c0_i32, %c0_i32_0 : i32, i32
  }
  func.func @transform_7(%arg0: i32) -> (i32, i32) {
    %c0_i32 = arith.constant 0 : i32
    %c0_i32_0 = arith.constant 0 : i32
    return %arg0, %c0_i32 : i32, i32
  }
}

module attributes {stable_mosaic.version = 11 : i64} {
  func.func @_convT_kernel(%arg0: i32, %arg1: memref<32x256xf32, #tpu.memory_space<vmem>>, %arg2: memref<256x8xf32, #tpu.memory_space<vmem>>, %arg3: memref<32x1xf32, #tpu.memory_space<vmem>>, %arg4: memref<32x8xf32, #tpu.memory_space<vmem>>, %arg5: memref<32x8xf32, #tpu.memory_space<vmem>>) attributes {dimension_semantics = [#tpu.dimension_semantics<parallel>], iteration_bounds = array<i64: 1>, scalar_prefetch = 0 : i64, scratch_operands = 0 : i64, tpu.core_type = #tpu.core_type<tc>, window_params = [{pipeline_mode = #tpu.pipeline_mode<synchronous>, transform_indices = @transform_0, window_bounds = array<i64: 32, 256>}, {transform_indices = @transform_1, window_bounds = array<i64: 256, 8>}, {pipeline_mode = #tpu.pipeline_mode<synchronous>, transform_indices = @transform_2, window_bounds = array<i64: 32, 1>}, {transform_indices = @transform_3, window_bounds = array<i64: 32, 8>}, {transform_indices = @transform_4, window_bounds = array<i64: 32, 8>}]} {
    %c0 = arith.constant 0 : index
    %c0_0 = arith.constant 0 : index
    %0 = vector.load %arg1[%c0, %c0_0] : memref<32x256xf32, #tpu.memory_space<vmem>>, vector<32x256xf32>
    %c0_1 = arith.constant 0 : index
    %c0_2 = arith.constant 0 : index
    %1 = vector.load %arg2[%c0_1, %c0_2] : memref<256x8xf32, #tpu.memory_space<vmem>>, vector<256x8xf32>
    %cst = arith.constant dense<0.000000e+00> : vector<32x8xf32>
    %2 = tpu.matmul %0, %1, %cst {dimension_numbers = #tpu.dot_dimension_numbers<[1], [0], [0], [1], [0, 0, 1, 1], [], []>} : vector<32x256xf32>, vector<256x8xf32>, vector<32x8xf32> -> vector<32x8xf32>
    %c0_3 = arith.constant 0 : index
    %c0_4 = arith.constant 0 : index
    %3 = vector.load %arg3[%c0_3, %c0_4] : memref<32x1xf32, #tpu.memory_space<vmem>>, vector<32x1xf32>
    %4 = vector.broadcast %3 : vector<32x1xf32> to vector<32x8xf32>
    %5 = arith.addf %2, %4 : vector<32x8xf32>
    %c0_5 = arith.constant 0 : index
    %c0_6 = arith.constant 0 : index
    %6 = vector.load %arg4[%c0_5, %c0_6] : memref<32x8xf32, #tpu.memory_space<vmem>>, vector<32x8xf32>
    %7 = arith.addf %5, %6 : vector<32x8xf32>
    %c0_7 = arith.constant 0 : index
    %c0_8 = arith.constant 0 : index
    %8 = vector.load %arg5[%c0_7, %c0_8] : memref<32x8xf32, #tpu.memory_space<vmem>>, vector<32x8xf32>
    tpu.vector_store %arg5[%c0_7, %c0_8], %7 {strides = array<i32>} : memref<32x8xf32, #tpu.memory_space<vmem>>, vector<32x8xf32>,
    return
  }
  func.func @transform_0(%arg0: i32) -> (i32, i32) {
    %c0_i32 = arith.constant 0 : i32
    %c0_i32_0 = arith.constant 0 : i32
    %c0_i32_1 = arith.constant 0 : i32
    return %c0_i32, %c0_i32_0 : i32, i32
  }
  func.func @transform_1(%arg0: i32) -> (i32, i32) {
    %c0_i32 = arith.constant 0 : i32
    %c0_i32_0 = arith.constant 0 : i32
    return %c0_i32, %arg0 : i32, i32
  }
  func.func @transform_2(%arg0: i32) -> (i32, i32) {
    %c0_i32 = arith.constant 0 : i32
    %c0_i32_0 = arith.constant 0 : i32
    %c0_i32_1 = arith.constant 0 : i32
    return %c0_i32, %c0_i32_0 : i32, i32
  }
  func.func @transform_3(%arg0: i32) -> (i32, i32) {
    %c0_i32 = arith.constant 0 : i32
    %c0_i32_0 = arith.constant 0 : i32
    return %c0_i32, %arg0 : i32, i32
  }
  func.func @transform_4(%arg0: i32) -> (i32, i32) {
    %c0_i32 = arith.constant 0 : i32
    %c0_i32_0 = arith.constant 0 : i32
    return %c0_i32, %arg0 : i32, i32
  }
}

module attributes {stable_mosaic.version = 11 : i64} {
  func.func @_mlp_kernel(%arg0: i32, %arg1: memref<2x128xf32, #tpu.memory_space<vmem>>, %arg2: memref<128x128xf32, #tpu.memory_space<vmem>>, %arg3: memref<1x128xf32, #tpu.memory_space<vmem>>, %arg4: memref<128x128xf32, #tpu.memory_space<vmem>>, %arg5: memref<1x128xf32, #tpu.memory_space<vmem>>, %arg6: memref<128x128xf32, #tpu.memory_space<vmem>>, %arg7: memref<1x128xf32, #tpu.memory_space<vmem>>, %arg8: memref<128x128xf32, #tpu.memory_space<vmem>>, %arg9: memref<1x128xf32, #tpu.memory_space<vmem>>, %arg10: memref<128x3xf32, #tpu.memory_space<vmem>>, %arg11: memref<1x3xf32, #tpu.memory_space<vmem>>, %arg12: memref<2x3xf32, #tpu.memory_space<vmem>>) attributes {dimension_semantics = [#tpu.dimension_semantics<parallel>], iteration_bounds = array<i64: 1>, scalar_prefetch = 0 : i64, scratch_operands = 0 : i64, tpu.core_type = #tpu.core_type<tc>, window_params = [{transform_indices = @transform_0, window_bounds = array<i64: 2, 128>}, {pipeline_mode = #tpu.pipeline_mode<synchronous>, transform_indices = @transform_1, window_bounds = array<i64: 128, 128>}, {pipeline_mode = #tpu.pipeline_mode<synchronous>, transform_indices = @transform_2, window_bounds = array<i64: 1, 128>}, {pipeline_mode = #tpu.pipeline_mode<synchronous>, transform_indices = @transform_3, window_bounds = array<i64: 128, 128>}, {pipeline_mode = #tpu.pipeline_mode<synchronous>, transform_indices = @transform_4, window_bounds = array<i64: 1, 128>}, {pipeline_mode = #tpu.pipeline_mode<synchronous>, transform_indices = @transform_5, window_bounds = array<i64: 128, 128>}, {pipeline_mode = #tpu.pipeline_mode<synchronous>, transform_indices = @transform_6, window_bounds = array<i64: 1, 128>}, {pipeline_mode = #tpu.pipeline_mode<synchronous>, transform_indices = @transform_7, window_bounds = array<i64: 128, 128>}, {pipeline_mode = #tpu.pipeline_mode<synchronous>, transform_indices = @transform_8, window_bounds = array<i64: 1, 128>}, {pipeline_mode = #tpu.pipeline_mode<synchronous>, transform_indices = @transform_9, window_bounds = array<i64: 128, 3>}, {pipeline_mode = #tpu.pipeline_mode<synchronous>, transform_indices = @transform_10, window_bounds = array<i64: 1, 3>}, {transform_indices = @transform_11, window_bounds = array<i64: 2, 3>}]} {
    %c0 = arith.constant 0 : index
    %c0_0 = arith.constant 0 : index
    %0 = vector.load %arg1[%c0, %c0_0] : memref<2x128xf32, #tpu.memory_space<vmem>>, vector<2x128xf32>
    %c0_1 = arith.constant 0 : index
    %c0_2 = arith.constant 0 : index
    %1 = vector.load %arg2[%c0_1, %c0_2] : memref<128x128xf32, #tpu.memory_space<vmem>>, vector<128x128xf32>
    %c0_3 = arith.constant 0 : index
    %c0_4 = arith.constant 0 : index
    %2 = vector.load %arg3[%c0_3, %c0_4] : memref<1x128xf32, #tpu.memory_space<vmem>>, vector<1x128xf32>
    %cst = arith.constant dense<0.000000e+00> : vector<2x128xf32>
    %3 = tpu.matmul %0, %1, %cst {dimension_numbers = #tpu.dot_dimension_numbers<[1], [0], [0], [1], [0, 0, 1, 1], [], []>} : vector<2x128xf32>, vector<128x128xf32>, vector<2x128xf32> -> vector<2x128xf32>
    %4 = vector.broadcast %2 : vector<1x128xf32> to vector<2x128xf32>
    %5 = arith.addf %3, %4 : vector<2x128xf32>
    %c0_5 = arith.constant 0 : index
    %c0_6 = arith.constant 0 : index
    %6 = vector.load %arg4[%c0_5, %c0_6] : memref<128x128xf32, #tpu.memory_space<vmem>>, vector<128x128xf32>
    %c0_7 = arith.constant 0 : index
    %c0_8 = arith.constant 0 : index
    %7 = vector.load %arg5[%c0_7, %c0_8] : memref<1x128xf32, #tpu.memory_space<vmem>>, vector<1x128xf32>
    %cst_9 = arith.constant dense<0.000000e+00> : vector<2x128xf32>
    %8 = tpu.matmul %5, %6, %cst_9 {dimension_numbers = #tpu.dot_dimension_numbers<[1], [0], [0], [1], [0, 0, 1, 1], [], []>} : vector<2x128xf32>, vector<128x128xf32>, vector<2x128xf32> -> vector<2x128xf32>
    %9 = vector.broadcast %7 : vector<1x128xf32> to vector<2x128xf32>
    %10 = arith.addf %8, %9 : vector<2x128xf32>
    %cst_10 = arith.constant 0.000000e+00 : f32
    %11 = vector.broadcast %cst_10 : f32 to vector<2x128xf32>
    %12 = arith.cmpf ogt, %10, %11 : vector<2x128xf32>
    %cst_11 = arith.constant 0.000000e+00 : f32
    %13 = vector.broadcast %cst_11 : f32 to vector<2x128xf32>
    %14 = arith.mulf %13, %10 : vector<2x128xf32>
    %15 = arith.select %12, %10, %14 : vector<2x128xi1>, vector<2x128xf32>
    %c0_12 = arith.constant 0 : index
    %c0_13 = arith.constant 0 : index
    %16 = vector.load %arg6[%c0_12, %c0_13] : memref<128x128xf32, #tpu.memory_space<vmem>>, vector<128x128xf32>
    %c0_14 = arith.constant 0 : index
    %c0_15 = arith.constant 0 : index
    %17 = vector.load %arg7[%c0_14, %c0_15] : memref<1x128xf32, #tpu.memory_space<vmem>>, vector<1x128xf32>
    %cst_16 = arith.constant dense<0.000000e+00> : vector<2x128xf32>
    %18 = tpu.matmul %15, %16, %cst_16 {dimension_numbers = #tpu.dot_dimension_numbers<[1], [0], [0], [1], [0, 0, 1, 1], [], []>} : vector<2x128xf32>, vector<128x128xf32>, vector<2x128xf32> -> vector<2x128xf32>
    %19 = vector.broadcast %17 : vector<1x128xf32> to vector<2x128xf32>
    %20 = arith.addf %18, %19 : vector<2x128xf32>
    %cst_17 = arith.constant 0.000000e+00 : f32
    %21 = vector.broadcast %cst_17 : f32 to vector<2x128xf32>
    %22 = arith.cmpf ogt, %20, %21 : vector<2x128xf32>
    %cst_18 = arith.constant 0.000000e+00 : f32
    %23 = vector.broadcast %cst_18 : f32 to vector<2x128xf32>
    %24 = arith.mulf %23, %20 : vector<2x128xf32>
    %25 = arith.select %22, %20, %24 : vector<2x128xi1>, vector<2x128xf32>
    %c0_19 = arith.constant 0 : index
    %c0_20 = arith.constant 0 : index
    %26 = vector.load %arg8[%c0_19, %c0_20] : memref<128x128xf32, #tpu.memory_space<vmem>>, vector<128x128xf32>
    %c0_21 = arith.constant 0 : index
    %c0_22 = arith.constant 0 : index
    %27 = vector.load %arg9[%c0_21, %c0_22] : memref<1x128xf32, #tpu.memory_space<vmem>>, vector<1x128xf32>
    %cst_23 = arith.constant dense<0.000000e+00> : vector<2x128xf32>
    %28 = tpu.matmul %25, %26, %cst_23 {dimension_numbers = #tpu.dot_dimension_numbers<[1], [0], [0], [1], [0, 0, 1, 1], [], []>} : vector<2x128xf32>, vector<128x128xf32>, vector<2x128xf32> -> vector<2x128xf32>
    %29 = vector.broadcast %27 : vector<1x128xf32> to vector<2x128xf32>
    %30 = arith.addf %28, %29 : vector<2x128xf32>
    %cst_24 = arith.constant 0.000000e+00 : f32
    %31 = vector.broadcast %cst_24 : f32 to vector<2x128xf32>
    %32 = arith.cmpf ogt, %30, %31 : vector<2x128xf32>
    %cst_25 = arith.constant 0.000000e+00 : f32
    %33 = vector.broadcast %cst_25 : f32 to vector<2x128xf32>
    %34 = arith.mulf %33, %30 : vector<2x128xf32>
    %35 = arith.select %32, %30, %34 : vector<2x128xi1>, vector<2x128xf32>
    %c0_26 = arith.constant 0 : index
    %c0_27 = arith.constant 0 : index
    %36 = vector.load %arg10[%c0_26, %c0_27] : memref<128x3xf32, #tpu.memory_space<vmem>>, vector<128x3xf32>
    %c0_28 = arith.constant 0 : index
    %c0_29 = arith.constant 0 : index
    %37 = vector.load %arg11[%c0_28, %c0_29] : memref<1x3xf32, #tpu.memory_space<vmem>>, vector<1x3xf32>
    %cst_30 = arith.constant dense<0.000000e+00> : vector<2x3xf32>
    %38 = tpu.matmul %35, %36, %cst_30 {dimension_numbers = #tpu.dot_dimension_numbers<[1], [0], [0], [1], [0, 0, 1, 1], [], []>} : vector<2x128xf32>, vector<128x3xf32>, vector<2x3xf32> -> vector<2x3xf32>
    %39 = vector.broadcast %37 : vector<1x3xf32> to vector<2x3xf32>
    %40 = arith.addf %38, %39 : vector<2x3xf32>
    %c0_31 = arith.constant 0 : index
    %c0_32 = arith.constant 0 : index
    %41 = vector.load %arg12[%c0_31, %c0_32] : memref<2x3xf32, #tpu.memory_space<vmem>>, vector<2x3xf32>
    tpu.vector_store %arg12[%c0_31, %c0_32], %40 {strides = array<i32>} : memref<2x3xf32, #tpu.memory_space<vmem>>, vector<2x3xf32>,
    return
  }
  func.func @transform_0(%arg0: i32) -> (i32, i32) {
    %c0_i32 = arith.constant 0 : i32
    %c0_i32_0 = arith.constant 0 : i32
    return %arg0, %c0_i32 : i32, i32
  }
  func.func @transform_1(%arg0: i32) -> (i32, i32) {
    %c0_i32 = arith.constant 0 : i32
    %c0_i32_0 = arith.constant 0 : i32
    %c0_i32_1 = arith.constant 0 : i32
    return %c0_i32, %c0_i32_0 : i32, i32
  }
  func.func @transform_2(%arg0: i32) -> (i32, i32) {
    %c0_i32 = arith.constant 0 : i32
    %c0_i32_0 = arith.constant 0 : i32
    %c0_i32_1 = arith.constant 0 : i32
    return %c0_i32, %c0_i32_0 : i32, i32
  }
  func.func @transform_3(%arg0: i32) -> (i32, i32) {
    %c0_i32 = arith.constant 0 : i32
    %c0_i32_0 = arith.constant 0 : i32
    %c0_i32_1 = arith.constant 0 : i32
    return %c0_i32, %c0_i32_0 : i32, i32
  }
  func.func @transform_4(%arg0: i32) -> (i32, i32) {
    %c0_i32 = arith.constant 0 : i32
    %c0_i32_0 = arith.constant 0 : i32
    %c0_i32_1 = arith.constant 0 : i32
    return %c0_i32, %c0_i32_0 : i32, i32
  }
  func.func @transform_5(%arg0: i32) -> (i32, i32) {
    %c0_i32 = arith.constant 0 : i32
    %c0_i32_0 = arith.constant 0 : i32
    %c0_i32_1 = arith.constant 0 : i32
    return %c0_i32, %c0_i32_0 : i32, i32
  }
  func.func @transform_6(%arg0: i32) -> (i32, i32) {
    %c0_i32 = arith.constant 0 : i32
    %c0_i32_0 = arith.constant 0 : i32
    %c0_i32_1 = arith.constant 0 : i32
    return %c0_i32, %c0_i32_0 : i32, i32
  }
  func.func @transform_7(%arg0: i32) -> (i32, i32) {
    %c0_i32 = arith.constant 0 : i32
    %c0_i32_0 = arith.constant 0 : i32
    %c0_i32_1 = arith.constant 0 : i32
    return %c0_i32, %c0_i32_0 : i32, i32
  }
  func.func @transform_8(%arg0: i32) -> (i32, i32) {
    %c0_i32 = arith.constant 0 : i32
    %c0_i32_0 = arith.constant 0 : i32
    %c0_i32_1 = arith.constant 0 : i32
    return %c0_i32, %c0_i32_0 : i32, i32
  }
  func.func @transform_9(%arg0: i32) -> (i32, i32) {
    %c0_i32 = arith.constant 0 : i32
    %c0_i32_0 = arith.constant 0 : i32
    %c0_i32_1 = arith.constant 0 : i32
    return %c0_i32, %c0_i32_0 : i32, i32
  }
  func.func @transform_10(%arg0: i32) -> (i32, i32) {
    %c0_i32 = arith.constant 0 : i32
    %c0_i32_0 = arith.constant 0 : i32
    %c0_i32_1 = arith.constant 0 : i32
    return %c0_i32, %c0_i32_0 : i32, i32
  }
  func.func @transform_11(%arg0: i32) -> (i32, i32) {
    %c0_i32 = arith.constant 0 : i32
    %c0_i32_0 = arith.constant 0 : i32
    return %arg0, %c0_i32 : i32, i32
  }
}

</mosaic_0001>

<bundles_post_ra>
// kernel: deterministic_policy_forward.5
= control target key start
LH: loop header
LB: loop body
LE: loop exit
PB: predicated region body
PF: predicated region fallthrough
CT: control target
= control target key end

     0   :  { %v160_v0 = vmov 0.0   ;;  %vm161_vm0 = vmmov 0   ;;  %v162_v3 = vmov 0   ;;  %vm33_vm1 = vcmask 785408   ;;  %s228_s1 = inlined_call_operand.vmem [shape: f32[96,128], index: 1, kind: input, shape index: {}]   ;;  %s229_s2 = inlined_call_operand.vmem [shape: f32[8,1], index: 2, kind: input, shape index: {}]   ;;  %s230_s0 = inlined_call_operand.vmem [shape: f32[8,96], index: 0, kind: input, shape index: {}]   ;;  %s231_s3 = inlined_call_operand.vmem [shape: f32[8,128], index: 3, kind: output, shape index: {}]  }
   0x1   :  { %129 = vmatprep.subr.mxu0 %v160_v0  ;;  %v26_v1 = vld [vmem:[%s228_s1 + $0x58] sm:$0xff]  ;;  %v25_v2 = vld [vmem:[%s228_s1 + $0x50] sm:$0xff]  ;;  %153 = vmatprep.mubr.msk.f32.mxu0 %vm161_vm0, %v160_v0  ;;  %v24_v4 = vld [vmem:[%s228_s1 + $0x48] sm:$0xff] }
   0x2   :  { %130 = vmatpush3.msra.mxu0 %v26_v1  ;;  %159 = vset.pattern.permute.xlu0 %v162_v3  ;;  %v23_v5 = vld [vmem:[%s228_s1 + $0x40] sm:$0xff]  ;;  %v22_v7 = vld [vmem:[%s228_s1 + $0x38] sm:$0xff]  ;;  %v21_v8 = vld [vmem:[%s228_s1 + $0x30] sm:$0xff] }
   0x3   :  { %131 = vmatprep.subr.mxu0 %v160_v0  ;;  %v27_v6 = vld [vmem:[%s229_s2] sm:$0xff]  ;;  %v20_v9 = vld [vmem:[%s228_s1 + $0x28] sm:$0xff]  ;;  %v18_v11 = vld [vmem:[%s228_s1 + $0x18] sm:$0xff] }
   0x4   :  { %132 = vmatpush3.msra.mxu0 %v25_v2  ;;  %30 = vperm.xlu0 %159, %v27_v6   ;;  %v19_v10 = vld [vmem:[%s228_s1 + $0x20] sm:$0xff]  ;;  %v17_v12 = vld [vmem:[%s228_s1 + $0x10] sm:$0xff]  ;;  %v16_v13 = vld [vmem:[%s228_s1 + $0x8] sm:$0xff] }
   0x5   :  { %133 = vmatprep.subr.mxu0 %v160_v0  ;;  %v15_v14 = vld [vmem:[%s228_s1] sm:$0xff] }
   0x6   :  { %134 = vmatpush3.msra.mxu0 %v24_v4  ;;  %v14_v15 = vld [vmem:[%s230_s0] sm:$0xff] }
   0x7   :  { %135 = vmatprep.subr.mxu0 %v160_v0 }
   0x8   :  { %136 = vmatpush3.msra.mxu0 %v23_v5 }
   0x9   :  { %137 = vmatprep.subr.mxu0 %v160_v0 }
   0xa   :  { %138 = vmatpush3.msra.mxu0 %v22_v7 }
   0xb   :  { %139 = vmatprep.subr.mxu0 %v160_v0 }
   0xc   :  { %140 = vmatpush3.msra.mxu0 %v21_v8 }
   0xd   :  { %141 = vmatprep.subr.mxu0 %v160_v0 }
   0xe   :  { %142 = vmatpush3.msra.mxu0 %v20_v9 }
   0xf   :  { %143 = vmatprep.subr.mxu0 %v160_v0 }
  0x10   :  { %144 = vmatpush3.msra.mxu0 %v19_v10 }
  0x11   :  { %145 = vmatprep.subr.mxu0 %v160_v0 }
  0x12   :  { %146 = vmatpush3.msra.mxu0 %v18_v11 }
  0x13   :  { %147 = vmatprep.subr.mxu0 %v160_v0 }
  0x14   :  { %148 = vmatpush3.msra.mxu0 %v17_v12 }
  0x15   :  { %149 = vmatprep.subr.mxu0 %v160_v0 }
  0x16   :  { %150 = vmatpush3.msra.mxu0 %v16_v13 }
  0x17   :  { %151 = vmatprep.subr.mxu0 %v160_v0 }
  0x18   :  { %152 = vmatpush3.msra.mxu0 %v15_v14 }
  0x19   :  { %154 = vmatmul.mubr.msk.f32.vlgmr.msra.gmra.mxu0 %vm33_vm1, %v14_v15 }
  0x7f   :  { %v31_v16 = vpop.permute.xlu0 %30 }
  0xd9   :  { %v103_v17 = vpop.f32.mrf.mxu0 }
  0xda   :  { %v104_v18 = vadd.f32 %v103_v17, %v31_v16 }
  0xdb   :  { %v155_v19 = vpop.f32.mrf.mxu0 }
  0xdc   :  { %vm107_vm2 = vcmp.gt.f32.partialorder %v104_v18, 0.0  ;;  %v108_v20 = vmul.f32 0.2, %v104_v18 }
  0xde   :  { %v109_v21 = vsel %vm107_vm2, %v104_v18, %v108_v20 }
  0xdf   :  { %110 = vst [vmem:[%s231_s3] sm:$0xff] %v109_v21 }

// kernel: deterministic_policy_forward.6
= control target key start
LH: loop header
LB: loop body
LE: loop exit
PB: predicated region body
PF: predicated region fallthrough
CT: control target
= control target key end

     0   :  { %v187_v2 = vmov 0   ;;  %vm125_vm1 = vcmask 261120   ;;  %s274_s1 = inlined_call_operand.vmem [shape: f32[128,32], index: 1, kind: input, shape index: {}]   ;;  %s275_s0 = inlined_call_operand.vmem [shape: f32[16,128], index: 0, kind: input, shape index: {}]   ;;  %s276_s2 = inlined_call_operand.vmem [shape: f32[16,1], index: 2, kind: input, shape index: {}]   ;;  %s277_s3 = inlined_call_operand.vmem [shape: f32[16,32], index: 3, kind: output, shape index: {}]  }
   0x1   :  { %v31_v0 = vld [vmem:[%s274_s1 + $0x78] sm:$0xff]  ;;  %v30_v1 = vld [vmem:[%s274_s1 + $0x70] sm:$0xff]  ;;  %186 = vset.pattern.permute.xlu0 %v187_v2  ;;  %v29_v3 = vld [vmem:[%s274_s1 + $0x68] sm:$0xff] }
   0x2   :  { %150 = vmatprep.subr.mxu0 %v31_v0  ;;  %v28_v4 = vld [vmem:[%s274_s1 + $0x60] sm:$0xff]  ;;  %v27_v6 = vld [vmem:[%s274_s1 + $0x58] sm:$0xff]  ;;  %v26_v8 = vld [vmem:[%s274_s1 + $0x50] sm:$0xff] }
   0x3   :  { %151 = vmatpush3.msra.mxu0 %v31_v0  ;;  %v14_v5 = vld [vmem:[%s275_s0] sm:$0xff]  ;;  %v33_v9 = vld [vmem:[%s276_s2 + $0x8] sm:$0xff]  ;;  %v23_v12 = vld [vmem:[%s274_s1 + $0x38] sm:$0xff] }
   0x4   :  { %152 = vmatprep.subr.mxu0 %v30_v1  ;;  %182 = vmatprep.mubr.f32.mxu0 %v14_v5  ;;  %v32_v7 = vld [vmem:[%s276_s2] sm:$0xff]  ;;  %v25_v10 = vld [vmem:[%s274_s1 + $0x48] sm:$0xff]  ;;  %v22_v13 = vld [vmem:[%s274_s1 + $0x30] sm:$0xff] }
   0x5   :  { %153 = vmatpush3.msra.mxu0 %v30_v1  ;;  %36 = vperm.xlu0 %186, %v32_v7   ;;  %v24_v11 = vld [vmem:[%s274_s1 + $0x40] sm:$0xff]  ;;  %v21_v14 = vld [vmem:[%s274_s1 + $0x28] sm:$0xff]  ;;  %v19_v16 = vld [vmem:[%s274_s1 + $0x18] sm:$0xff] }
   0x6   :  { %154 = vmatprep.subr.mxu0 %v29_v3  ;;  %v20_v15 = vld [vmem:[%s274_s1 + $0x20] sm:$0xff]  ;;  %v18_v17 = vld [vmem:[%s274_s1 + $0x10] sm:$0xff]  ;;  %v17_v18 = vld [vmem:[%s274_s1 + $0x8] sm:$0xff] }
   0x7   :  { %155 = vmatpush3.msra.mxu0 %v29_v3  ;;  %v16_v19 = vld [vmem:[%s274_s1] sm:$0xff]  ;;  %v15_v20 = vld [vmem:[%s275_s0 + $0x8] sm:$0xff] }
   0x8   :  { %156 = vmatprep.subr.mxu0 %v28_v4 }
   0x9   :  { %157 = vmatpush3.msra.mxu0 %v28_v4  ;;  %41 = vperm.xlu0 %186, %v33_v9  }
   0xa   :  { %158 = vmatprep.subr.mxu0 %v27_v6 }
   0xb   :  { %159 = vmatpush3.msra.mxu0 %v27_v6 }
   0xc   :  { %160 = vmatprep.subr.mxu0 %v26_v8 }
   0xd   :  { %161 = vmatpush3.msra.mxu0 %v26_v8 }
   0xe   :  { %162 = vmatprep.subr.mxu0 %v25_v10 }
   0xf   :  { %163 = vmatpush3.msra.mxu0 %v25_v10 }
  0x10   :  { %164 = vmatprep.subr.mxu0 %v24_v11 }
  0x11   :  { %165 = vmatpush3.msra.mxu0 %v24_v11 }
  0x12   :  { %166 = vmatprep.subr.mxu0 %v23_v12 }
  0x13   :  { %167 = vmatpush3.msra.mxu0 %v23_v12 }
  0x14   :  { %168 = vmatprep.subr.mxu0 %v22_v13 }
  0x15   :  { %169 = vmatpush3.msra.mxu0 %v22_v13 }
  0x16   :  { %170 = vmatprep.subr.mxu0 %v21_v14 }
  0x17   :  { %171 = vmatpush3.msra.mxu0 %v21_v14 }
  0x18   :  { %172 = vmatprep.subr.mxu0 %v20_v15 }
  0x19   :  { %173 = vmatpush3.msra.mxu0 %v20_v15 }
  0x1a   :  { %174 = vmatprep.subr.mxu0 %v19_v16 }
  0x1b   :  { %175 = vmatpush3.msra.mxu0 %v19_v16 }
  0x1c   :  { %176 = vmatprep.subr.mxu0 %v18_v17 }
  0x1d   :  { %177 = vmatpush3.msra.mxu0 %v18_v17 }
  0x1e   :  { %178 = vmatprep.subr.mxu0 %v17_v18 }
  0x1f   :  { %179 = vmatpush3.msra.mxu0 %v17_v18 }
  0x20   :  { %180 = vmatprep.subr.mxu0 %v16_v19 }
  0x21   :  { %181 = vmatpush3.msra.mxu0 %v16_v19 }
  0x22   :  { %183 = vmatmul.mubr.f32.vlgmr.msra.gmra.mxu0 %v15_v20 }
  0x80   :  { %v37_v21 = vpop.permute.xlu0 %36 }
  0x84   :  { %v42_v22 = vpop.permute.xlu0 %41 }
  0xe2   :  { %v184_v23 = vpop.f32.mrf.mxu0 }
  0xe3   :  { %v116_v24 = vadd.f32 %v184_v23, %v42_v22 }
  0xe4   :  { %v110_v25 = vpop.f32.mrf.mxu0 }
  0xe5   :  { %vm120_vm0 = vcmp.gt.f32.partialorder %v116_v24, 0.0  ;;  %v122_v26 = vmul.f32 0.2, %v116_v24  ;;  %v111_v27 = vadd.f32 %v110_v25, %v37_v21 }
  0xe7   :  { %v124_v28 = vsel %vm120_vm0, %v116_v24, %v122_v26  ;;  %vm119_vm2 = vcmp.gt.f32.partialorder %v111_v27, 0.0  ;;  %v121_v29 = vmul.f32 0.2, %v111_v27 }
  0xe8   :  { %127 = vst.msk [vmem:[%s277_s3 + $0x8] sm:$0xff] %vm125_vm1, %v124_v28 }
  0xe9   :  { %v123_v30 = vsel %vm119_vm2, %v111_v27, %v121_v29 }
  0xea   :  { %126 = vst.msk [vmem:[%s277_s3] sm:$0xff] %vm125_vm1, %v123_v30 }

// kernel: deterministic_policy_forward.7
= control target key start
LH: loop header
LB: loop body
LE: loop exit
PB: predicated region body
PF: predicated region fallthrough
CT: control target
= control target key end

     0   :  { %vm35_vm0 = vcmask 64512   ;;  %v336_v0 = vmov 0.0   ;;  %vm337_vm1 = vmmov 0   ;;  %vm123_vm3 = vcmask 261120   ;;  %s422_s1 = inlined_call_operand.vmem [shape: f32[8,32], index: 1, kind: input, shape index: {}]   ;;  %s423_s0 = inlined_call_operand.vmem [shape: f32[2,8], index: 0, kind: input, shape index: {}]   ;;  %s424_s3 = inlined_call_operand.vmem [shape: f32[32,32], index: 3, kind: input, shape index: {}]   ;;  %s425_s5 = inlined_call_operand.vmem [shape: f32[32,128], index: 5, kind: input, shape index: {}]   ;;  %s426_s2 = inlined_call_operand.vmem [shape: f32[1,32], index: 2, kind: input, shape index: {}]   ;;  %s427_s4 = inlined_call_operand.vmem [shape: f32[1,32], index: 4, kind: input, shape index: {}]   ;;  %s428_s6 = inlined_call_operand.vmem [shape: f32[1,128], index: 6, kind: input, shape index: {}]   ;;  %s429_s7 = inlined_call_operand.vmem [shape: f32[2,128], index: 7, kind: output, shape index: {}]  }
   0x1   :  { %307 = vmatprep.subr.mxu0 %v336_v0  ;;  %v27_v1 = vld [vmem:[%s422_s1] sm:$0xff]  ;;  %309 = vmatprep.mubr.msk.f32.mxu0 %vm337_vm1, %v336_v0  ;;  %v115_v3 = vld [vmem:[%s424_s3 + $0x18] sm:$0xff]  ;;  %v114_v4 = vld [vmem:[%s424_s3 + $0x10] sm:$0xff] }
   0x2   :  { %v26_v2 = vld [vmem:[%s423_s0] sm:$0x3]  ;;  %308 = vmatpush3.msra.mxu0 %v27_v1  ;;  %312 = vmatprep.subr.mxu1 %v336_v0  ;;  %v113_v5 = vld [vmem:[%s424_s3 + $0x8] sm:$0xff]  ;;  %v203_v7 = vld [vmem:[%s425_s5 + $0x18] sm:$0xff] }
   0x3   :  { %310 = vmatmul.mubr.msk.f32.vlgmr.msra.gmra.mxu0 %vm35_vm0, %v26_v2  ;;  %313 = vmatpush3.msra.mxu1 %v115_v3  ;;  %v112_v6 = vld [vmem:[%s424_s3] sm:$0xff]  ;;  %v202_v14 = vld [vmem:[%s425_s5 + $0x10] sm:$0xff]  ;;  %v201_v15 = vld [vmem:[%s425_s5 + $0x8] sm:$0xff] }
   0x4   :  { %314 = vmatprep.subr.mxu1 %v336_v0  ;;  %320 = vmatprep.mubr.msk.f32.mxu1 %vm337_vm1, %v336_v0  ;;  %v289_v8 = vld [vmem:[%s426_s2] ss:$0 sm:$0xff] }
   0x5   :  { %323 = vmatprep.subr.mxu0 %v336_v0  ;;  %331 = vmatprep.mubr.msk.f32.mxu0 %vm337_vm1, %v336_v0  ;;  %v200_v16 = vld [vmem:[%s425_s5] sm:$0xff] }
   0x6   :  { %315 = vmatpush3.msra.mxu1 %v114_v4  ;;  %324 = vmatpush3.msra.mxu0 %v203_v7  ;;  %v291_v17 = vld [vmem:[%s427_s4] ss:$0 sm:$0xff] }
   0x7   :  { %316 = vmatprep.subr.mxu1 %v336_v0  ;;  %325 = vmatprep.subr.mxu0 %v336_v0  ;;  %v293_v23 = vld [vmem:[%s428_s6] ss:$0 sm:$0xff] }
   0x8   :  { %317 = vmatpush3.msra.mxu1 %v113_v5  ;;  %326 = vmatpush3.msra.mxu0 %v202_v14 }
   0x9   :  { %318 = vmatprep.subr.mxu1 %v336_v0  ;;  %327 = vmatprep.subr.mxu0 %v336_v0 }
   0xa   :  { %319 = vmatpush3.msra.mxu1 %v112_v6  ;;  %328 = vmatpush3.msra.mxu0 %v201_v15 }
   0xb   :  { %329 = vmatprep.subr.mxu0 %v336_v0 }
   0xc   :  { %330 = vmatpush3.msra.mxu0 %v200_v16 }
  0xc3   :  { %v105_v9 = vpop.f32.mrf.mxu0 }
  0xc4   :  { %v106_v10 = vadd.f32 %v289_v8, %v105_v9 }
  0xc5   :  { %v311_v11 = vpop.f32.mrf.mxu0 }
  0xc6   :  { %vm109_vm2 = vcmp.gt.f32.partialorder %v106_v10, 0.0  ;;  %v110_v12 = vmul.f32 0.2, %v106_v10 }
  0xc8   :  { %v111_v13 = vsel %vm109_vm2, %v106_v10, %v110_v12 }
  0xc9   :  { %321 = vmatmul.mubr.msk.f32.vlgmr.msra.gmra.mxu1 %vm123_vm3, %v111_v13 }
 0x189   :  { %v193_v18 = vpop.f32.mrf.mxu1 }
 0x18a   :  { %v194_v19 = vadd.f32 %v291_v17, %v193_v18 }
 0x18b   :  { %v322_v20 = vpop.f32.mrf.mxu1 }
 0x18c   :  { %vm197_vm4 = vcmp.gt.f32.partialorder %v194_v19, 0.0  ;;  %v198_v21 = vmul.f32 0.2, %v194_v19 }
 0x18e   :  { %v199_v22 = vsel %vm197_vm4, %v194_v19, %v198_v21 }
 0x18f   :  { %332 = vmatmul.mubr.msk.f32.vlgmr.msra.gmra.mxu0 %vm123_vm3, %v199_v22 }
 0x24f   :  { %v280_v24 = vpop.f32.mrf.mxu0 }
 0x250   :  { %v281_v25 = vadd.f32 %v293_v23, %v280_v24 }
 0x251   :  { %v333_v26 = vpop.f32.mrf.mxu0 }
 0x252   :  { %284 = vst [vmem:[%s429_s7] sm:$0x3] %v281_v25 }

// kernel: deterministic_policy_forward.8
= control target key start
LH: loop header
LB: loop body
LE: loop exit
PB: predicated region body
PF: predicated region fallthrough
CT: control target
= control target key end

     0   :  { %v262_v3 = vmov 0   ;;  %vm174_vm0 = vcmask 64512   ;;  %s448_s1 = inlined_call_operand.vmem [shape: f32[256,8], index: 1, kind: input, shape index: {}]   ;;  %s449_s0 = inlined_call_operand.vmem [shape: f32[32,256], index: 0, kind: input, shape index: {}]   ;;  %s450_s2 = inlined_call_operand.vmem [shape: f32[32,1], index: 2, kind: input, shape index: {}]   ;;  %s451_s3 = inlined_call_operand.vmem [shape: f32[32,8], index: 3, kind: input, shape index: {}]   ;;  %s452_s4 = inlined_call_operand.vmem [shape: f32[32,8], index: 4, kind: output, shape index: {}]  }
   0x1   :  { %v56_v0 = vld [vmem:[%s448_s1 + $0xf8] sm:$0xff]  ;;  %v55_v2 = vld [vmem:[%s448_s1 + $0xf0] sm:$0xff]  ;;  %261 = vset.pattern.permute.xlu1 %v262_v3  ;;  %260 = vset.pattern.permute.xlu0 %v262_v3  ;;  %v54_v5 = vld [vmem:[%s448_s1 + $0xe8] sm:$0xff] }
   0x2   :  { %v40_v1 = vld [vmem:[%s448_s1 + $0x78] sm:$0xff]  ;;  %183 = vmatprep.subr.mxu0 %v56_v0  ;;  %227 = vmatprep.subr.mxu1 %v56_v0  ;;  %v39_v4 = vld [vmem:[%s448_s1 + $0x70] sm:$0xff]  ;;  %v38_v6 = vld [vmem:[%s448_s1 + $0x68] sm:$0xff] }
   0x3   :  { %184 = vmatpush3.msra.mxu0 %v40_v1  ;;  %243 = vmatpush3.msra.mxu1 %v40_v1  ;;  %v53_v7 = vld [vmem:[%s448_s1 + $0xe0] sm:$0xff]  ;;  %v52_v9 = vld [vmem:[%s448_s1 + $0xd8] sm:$0xff]  ;;  %v51_v11 = vld [vmem:[%s448_s1 + $0xd0] sm:$0xff] }
   0x4   :  { %185 = vmatprep.subr.mxu0 %v55_v2  ;;  %228 = vmatprep.subr.mxu1 %v55_v2  ;;  %v37_v8 = vld [vmem:[%s448_s1 + $0x60] sm:$0xff]  ;;  %v36_v10 = vld [vmem:[%s448_s1 + $0x58] sm:$0xff]  ;;  %v35_v12 = vld [vmem:[%s448_s1 + $0x50] sm:$0xff] }
   0x5   :  { %186 = vmatpush3.msra.mxu0 %v39_v4  ;;  %244 = vmatpush3.msra.mxu1 %v39_v4  ;;  %v50_v13 = vld [vmem:[%s448_s1 + $0xc8] sm:$0xff]  ;;  %v49_v15 = vld [vmem:[%s448_s1 + $0xc0] sm:$0xff]  ;;  %v48_v17 = vld [vmem:[%s448_s1 + $0xb8] sm:$0xff] }
   0x6   :  { %187 = vmatprep.subr.mxu0 %v54_v5  ;;  %229 = vmatprep.subr.mxu1 %v54_v5  ;;  %v34_v14 = vld [vmem:[%s448_s1 + $0x48] sm:$0xff]  ;;  %v33_v16 = vld [vmem:[%s448_s1 + $0x40] sm:$0xff]  ;;  %v32_v18 = vld [vmem:[%s448_s1 + $0x38] sm:$0xff] }
   0x7   :  { %188 = vmatpush3.msra.mxu0 %v38_v6  ;;  %245 = vmatpush3.msra.mxu1 %v38_v6  ;;  %v47_v19 = vld [vmem:[%s448_s1 + $0xb0] sm:$0xff]  ;;  %v46_v21 = vld [vmem:[%s448_s1 + $0xa8] sm:$0xff]  ;;  %v45_v23 = vld [vmem:[%s448_s1 + $0xa0] sm:$0xff] }
   0x8   :  { %189 = vmatprep.subr.mxu0 %v53_v7  ;;  %230 = vmatprep.subr.mxu1 %v53_v7  ;;  %v31_v20 = vld [vmem:[%s448_s1 + $0x30] sm:$0xff]  ;;  %v30_v22 = vld [vmem:[%s448_s1 + $0x28] sm:$0xff]  ;;  %v29_v24 = vld [vmem:[%s448_s1 + $0x20] sm:$0xff] }
   0x9   :  { %190 = vmatpush3.msra.mxu0 %v37_v8  ;;  %246 = vmatpush3.msra.mxu1 %v37_v8  ;;  %v44_v25 = vld [vmem:[%s448_s1 + $0x98] sm:$0xff]  ;;  %v43_v27 = vld [vmem:[%s448_s1 + $0x90] sm:$0xff]  ;;  %v42_v29 = vld [vmem:[%s448_s1 + $0x88] sm:$0xff] }
   0xa   :  { %191 = vmatprep.subr.mxu0 %v52_v9  ;;  %231 = vmatprep.subr.mxu1 %v52_v9  ;;  %v28_v26 = vld [vmem:[%s448_s1 + $0x18] sm:$0xff]  ;;  %v27_v28 = vld [vmem:[%s448_s1 + $0x10] sm:$0xff]  ;;  %v26_v30 = vld [vmem:[%s448_s1 + $0x8] sm:$0xff] }
   0xb   :  { %192 = vmatpush3.msra.mxu0 %v36_v10  ;;  %247 = vmatpush3.msra.mxu1 %v36_v10  ;;  %v41_v31 = vld [vmem:[%s448_s1 + $0x80] sm:$0xff]  ;;  %v18_v33 = vld [vmem:[%s449_s0 + $0x8] sm:$0xff]  ;;  %v20_v37 = vld [vmem:[%s449_s0 + $0x18] sm:$0xff] }
   0xc   :  { %193 = vmatprep.subr.mxu0 %v51_v11  ;;  %232 = vmatprep.subr.mxu1 %v51_v11  ;;  %v25_v32 = vld [vmem:[%s448_s1] sm:$0xff]  ;;  %v22_v34 = vld [vmem:[%s449_s0 + $0x28] sm:$0xff]  ;;  %v24_v38 = vld [vmem:[%s449_s0 + $0x38] sm:$0xff] }
   0xd   :  { %194 = vmatpush3.msra.mxu0 %v35_v12  ;;  %248 = vmatpush3.msra.mxu1 %v35_v12  ;;  %v17_v35 = vld [vmem:[%s449_s0] sm:$0xff]  ;;  %v59_v39 = vld [vmem:[%s450_s2 + $0x10] sm:$0xff]  ;;  %v60_v43 = vld [vmem:[%s450_s2 + $0x18] sm:$0xff] }
   0xe   :  { %195 = vmatprep.subr.mxu0 %v50_v13  ;;  %233 = vmatprep.subr.mxu1 %v50_v13  ;;  %v21_v36 = vld [vmem:[%s449_s0 + $0x20] sm:$0xff]  ;;  %v19_v41 = vld [vmem:[%s449_s0 + $0x10] sm:$0xff]  ;;  %v58_v44 = vld [vmem:[%s450_s2 + $0x8] sm:$0xff] }
   0xf   :  { %196 = vmatpush3.msra.mxu0 %v34_v14  ;;  %249 = vmatpush3.msra.mxu1 %v34_v14  ;;  %v57_v40 = vld [vmem:[%s450_s2] sm:$0xff]  ;;  %v23_v42 = vld [vmem:[%s449_s0 + $0x30] sm:$0xff]  ;;  %v167_v3 = vld [vmem:[%s451_s3 + $0x8] sm:$0xff] }
  0x10   :  { %197 = vmatprep.subr.mxu0 %v49_v15  ;;  %234 = vmatprep.subr.mxu1 %v49_v15  ;;  %v166_v53 = vld [vmem:[%s451_s3] sm:$0xff]  ;;  %v168_v54 = vld [vmem:[%s451_s3 + $0x10] sm:$0xff]  ;;  %v169_v4 = vld [vmem:[%s451_s3 + $0x18] sm:$0xff] }
  0x11   :  { %198 = vmatpush3.msra.mxu0 %v33_v16  ;;  %250 = vmatpush3.msra.mxu1 %v33_v16 }
  0x12   :  { %199 = vmatprep.subr.mxu0 %v48_v17  ;;  %235 = vmatprep.subr.mxu1 %v48_v17 }
  0x13   :  { %200 = vmatpush3.msra.mxu0 %v32_v18  ;;  %251 = vmatpush3.msra.mxu1 %v32_v18 }
  0x14   :  { %201 = vmatprep.subr.mxu0 %v47_v19  ;;  %236 = vmatprep.subr.mxu1 %v47_v19 }
  0x15   :  { %202 = vmatpush3.msra.mxu0 %v31_v20  ;;  %252 = vmatpush3.msra.mxu1 %v31_v20 }
  0x16   :  { %203 = vmatprep.subr.mxu0 %v46_v21  ;;  %237 = vmatprep.subr.mxu1 %v46_v21 }
  0x17   :  { %204 = vmatpush3.msra.mxu0 %v30_v22  ;;  %253 = vmatpush3.msra.mxu1 %v30_v22 }
  0x18   :  { %205 = vmatprep.subr.mxu0 %v45_v23  ;;  %238 = vmatprep.subr.mxu1 %v45_v23 }
  0x19   :  { %206 = vmatpush3.msra.mxu0 %v29_v24  ;;  %254 = vmatpush3.msra.mxu1 %v29_v24 }
  0x1a   :  { %207 = vmatprep.subr.mxu0 %v44_v25  ;;  %239 = vmatprep.subr.mxu1 %v44_v25 }
  0x1b   :  { %208 = vmatpush3.msra.mxu0 %v28_v26  ;;  %255 = vmatpush3.msra.mxu1 %v28_v26 }
  0x1c   :  { %209 = vmatprep.subr.mxu0 %v43_v27  ;;  %240 = vmatprep.subr.mxu1 %v43_v27 }
  0x1d   :  { %210 = vmatpush3.msra.mxu0 %v27_v28  ;;  %256 = vmatpush3.msra.mxu1 %v27_v28 }
  0x1e   :  { %211 = vmatprep.subr.mxu0 %v42_v29  ;;  %241 = vmatprep.subr.mxu1 %v42_v29 }
  0x1f   :  { %212 = vmatpush3.msra.mxu0 %v26_v30  ;;  %257 = vmatpush3.msra.mxu1 %v26_v30 }
  0x20   :  { %213 = vmatprep.subr.mxu0 %v41_v31  ;;  %242 = vmatprep.subr.mxu1 %v41_v31 }
  0x21   :  { %214 = vmatpush3.msra.mxu0 %v25_v32  ;;  %258 = vmatpush3.msra.mxu1 %v25_v32 }
  0x22   :  { %145 = vmatprep.mubr.f32.mxu0 %v18_v33  ;;  %155 = vmatprep.mubr.f32.mxu1 %v22_v34 }
  0x23   :  { %146 = vmatmul.mubr.f32.vlgmr.msra.gmra.mxu0 %v17_v35  ;;  %156 = vmatmul.mubr.f32.vlgmr.msra.gmra.mxu1 %v21_v36 }
  0x24   :  { %150 = vmatprep.mubr.f32.mxu0 %v20_v37  ;;  %160 = vmatprep.mubr.f32.mxu1 %v24_v38 }
  0x25   :  { %73 = vperm.xlu1 %261, %v59_v39   ;;  %63 = vperm.xlu0 %260, %v57_v40  }
  0x27   :  { %151 = vmatmul.mubr.f32.gmra.mxu0 %v19_v41  ;;  %161 = vmatmul.mubr.f32.gmra.mxu1 %v23_v42 }
  0x29   :  { %78 = vperm.xlu1 %261, %v60_v43   ;;  %68 = vperm.xlu0 %260, %v58_v44  }
  0xa0   :  { %v74_v47 = vpop.permute.xlu1 %73  ;;  %v64_v48 = vpop.permute.xlu0 %63 }
  0xa4   :  { %v79_v1 = vpop.permute.xlu1 %78  ;;  %v69_v2 = vpop.permute.xlu0 %68 }
  0xe3   :  { %v215_v45 = vpop.f32.mrf.mxu0  ;;  %v221_v46 = vpop.f32.mrf.mxu1 }
  0xe5   :  { %v216_v49 = vpop.f32.mrf.mxu0  ;;  %v222_v50 = vpop.f32.mrf.mxu1 }
  0xe6   :  { %v217_v51 = vadd.f32 %v216_v49, %v215_v45  ;;  %v223_v52 = vadd.f32 %v222_v50, %v221_v46 }
  0xe7   :  { %v218_v55 = vpop.f32.mrf.mxu0  ;;  %v224_v56 = vpop.f32.mrf.mxu1 }
  0xe8   :  { %v148_v57 = vadd.f32 %v217_v51, %v64_v48  ;;  %v158_v58 = vadd.f32 %v223_v52, %v74_v47 }
  0xe9   :  { %v219_v59 = vpop.f32.mrf.mxu0  ;;  %v225_v60 = vpop.f32.mrf.mxu1 }
  0xea   :  { %v170_v61 = vadd.f32 %v166_v53, %v148_v57  ;;  %v172_v62 = vadd.f32 %v168_v54, %v158_v58  ;;  %v220_v63 = vadd.f32 %v219_v59, %v218_v55  ;;  %v226_v0 = vadd.f32 %v225_v60, %v224_v56 }
  0xec   :  { %175 = vst.msk [vmem:[%s452_s4] sm:$0xff] %vm174_vm0, %v170_v61  ;;  %177 = vst.msk [vmem:[%s452_s4 + $0x10] sm:$0xff] %vm174_vm0, %v172_v62  ;;  %v153_v5 = vadd.f32 %v220_v63, %v69_v2  ;;  %v163_v6 = vadd.f32 %v226_v0, %v79_v1 }
  0xee   :  { %v171_v7 = vadd.f32 %v167_v3, %v153_v5  ;;  %v173_v8 = vadd.f32 %v169_v4, %v163_v6 }
  0xf0   :  { %176 = vst.msk [vmem:[%s452_s4 + $0x8] sm:$0xff] %vm174_vm0, %v171_v7  ;;  %178 = vst.msk [vmem:[%s452_s4 + $0x18] sm:$0xff] %vm174_vm0, %v173_v8 }

// kernel: deterministic_policy_forward.9
= control target key start
LH: loop header
LB: loop body
LE: loop exit
PB: predicated region body
PF: predicated region fallthrough
CT: control target
= control target key end

     0   :  { %v820_v1 = vmov 0.0   ;;  %vm821_vm0 = vmmov 0   ;;  %s1234_s0 = inlined_call_operand.vmem [shape: f32[2,128], index: 0, kind: input, shape index: {}]   ;;  %s1235_s1 = inlined_call_operand.vmem [shape: f32[128,128], index: 1, kind: input, shape index: {}]   ;;  %s1236_s2 = inlined_call_operand.vmem [shape: f32[1,128], index: 2, kind: input, shape index: {}]   ;;  %s1237_s3 = inlined_call_operand.vmem [shape: f32[128,128], index: 3, kind: input, shape index: {}]   ;;  %s1238_s4 = inlined_call_operand.vmem [shape: f32[1,128], index: 4, kind: input, shape index: {}]   ;;  %s1239_s5 = inlined_call_operand.vmem [shape: f32[128,128], index: 5, kind: input, shape index: {}]   ;;  %s1240_s6 = inlined_call_operand.vmem [shape: f32[1,128], index: 6, kind: input, shape index: {}]   ;;  %s1241_s7 = inlined_call_operand.vmem [shape: f32[128,128], index: 7, kind: input, shape index: {}]   ;;  %s1242_s8 = inlined_call_operand.vmem [shape: f32[1,128], index: 8, kind: input, shape index: {}]   ;;  %s1243_s9 = inlined_call_operand.vmem [shape: f32[128,3], index: 9, kind: input, shape index: {}]   ;;  %s1244_s10 = inlined_call_operand.vmem [shape: f32[1,3], index: 10, kind: input, shape index: {}]   ;;  %s1245_s11 = inlined_call_operand.hbm [shape: f32[2,3], index: 11, kind: output, shape index: {}]  }
   0x1   :  { %v55_v0 = vld [vmem:[%s1235_s1 + $0x78] sm:$0xff]  ;;  %620 = vmatprep.subr.mxu0 %v820_v1  ;;  %v54_v2 = vld [vmem:[%s1235_s1 + $0x70] sm:$0xff]  ;;  %652 = vmatprep.mubr.msk.f32.mxu0 %vm821_vm0, %v820_v1  ;;  %v53_v3 = vld [vmem:[%s1235_s1 + $0x68] sm:$0xff] }
   0x2   :  { %621 = vmatpush3.msra.mxu0 %v55_v0  ;;  %655 = vmatprep.subr.mxu1 %v820_v1  ;;  %v52_v4 = vld [vmem:[%s1235_s1 + $0x60] sm:$0xff]  ;;  %v148_v5 = vld [vmem:[%s1237_s3 + $0x78] sm:$0xff]  ;;  %v147_v6 = vld [vmem:[%s1237_s3 + $0x70] sm:$0xff] }
   0x3   :  { %622 = vmatprep.subr.mxu0 %v820_v1  ;;  %687 = vmatprep.mubr.msk.f32.mxu1 %vm821_vm0, %v820_v1  ;;  %v51_v7 = vld [vmem:[%s1235_s1 + $0x58] sm:$0xff]  ;;  %v146_v8 = vld [vmem:[%s1237_s3 + $0x68] sm:$0xff]  ;;  %v50_v9 = vld [vmem:[%s1235_s1 + $0x50] sm:$0xff] }
   0x4   :  { %623 = vmatpush3.msra.mxu0 %v54_v2  ;;  %656 = vmatpush3.msra.mxu1 %v148_v5  ;;  %v145_v10 = vld [vmem:[%s1237_s3 + $0x60] sm:$0xff] }
   0x5   :  { %624 = vmatprep.subr.mxu0 %v820_v1  ;;  %657 = vmatprep.subr.mxu1 %v820_v1 }
   0x6   :  { %625 = vmatpush3.msra.mxu0 %v53_v3  ;;  %658 = vmatpush3.msra.mxu1 %v147_v6 }
   0x7   :  { %626 = vmatprep.subr.mxu0 %v820_v1  ;;  %659 = vmatprep.subr.mxu1 %v820_v1 }
   0x8   :  { %627 = vmatpush3.msra.mxu0 %v52_v4  ;;  %660 = vmatpush3.msra.mxu1 %v146_v8 }
   0x9   :  { %628 = vmatprep.subr.mxu0 %v820_v1 }
   0xa   :  { %629 = vmatpush3.msra.mxu0 %v51_v7 }
   0xb   :  { %16 = vsyncpa [#allocation3], 0  ;;  %630 = vmatprep.subr.mxu0 %v820_v1  ;;  %v49_v11 = vld [vmem:[%s1235_s1 + $0x48] sm:$0xff]  ;;  %661 = vmatprep.subr.mxu1 %v820_v1  ;;  %v144_v12 = vld [vmem:[%s1237_s3 + $0x58] sm:$0xff]  ;;  %s822_s30 = smov [#allocation2]   ;;  %vm514_vm4 = vcmask 17408  }
   0xc   :  { %631 = vmatpush3.msra.mxu0 %v50_v9  ;;  %662 = vmatpush3.msra.mxu1 %v145_v10  ;;  %v48_v13 = vld [vmem:[%s1235_s1 + $0x40] sm:$0xff]  ;;  %v143_v14 = vld [vmem:[%s1237_s3 + $0x50] sm:$0xff]  ;;  %v47_v15 = vld [vmem:[%s1235_s1 + $0x38] sm:$0xff] }
   0xd   :  { %632 = vmatprep.subr.mxu0 %v820_v1  ;;  %663 = vmatprep.subr.mxu1 %v820_v1  ;;  %v142_v16 = vld [vmem:[%s1237_s3 + $0x48] sm:$0xff]  ;;  %v46_v17 = vld [vmem:[%s1235_s1 + $0x30] sm:$0xff]  ;;  %v141_v18 = vld [vmem:[%s1237_s3 + $0x40] sm:$0xff] }
   0xe   :  { %633 = vmatpush3.msra.mxu0 %v49_v11  ;;  %664 = vmatpush3.msra.mxu1 %v144_v12  ;;  %v45_v19 = vld [vmem:[%s1235_s1 + $0x28] sm:$0xff]  ;;  %v140_v20 = vld [vmem:[%s1237_s3 + $0x38] sm:$0xff]  ;;  %v44_v21 = vld [vmem:[%s1235_s1 + $0x20] sm:$0xff] }
   0xf   :  { %634 = vmatprep.subr.mxu0 %v820_v1  ;;  %665 = vmatprep.subr.mxu1 %v820_v1  ;;  %v139_v22 = vld [vmem:[%s1237_s3 + $0x30] sm:$0xff]  ;;  %v43_v23 = vld [vmem:[%s1235_s1 + $0x18] sm:$0xff]  ;;  %v138_v24 = vld [vmem:[%s1237_s3 + $0x28] sm:$0xff] }
  0x10   :  { %635 = vmatpush3.msra.mxu0 %v48_v13  ;;  %666 = vmatpush3.msra.mxu1 %v143_v14  ;;  %v42_v25 = vld [vmem:[%s1235_s1 + $0x10] sm:$0xff]  ;;  %v137_v26 = vld [vmem:[%s1237_s3 + $0x20] sm:$0xff]  ;;  %v41_v27 = vld [vmem:[%s1235_s1 + $0x8] sm:$0xff] }
  0x11   :  { %636 = vmatprep.subr.mxu0 %v820_v1  ;;  %667 = vmatprep.subr.mxu1 %v820_v1  ;;  %v136_v28 = vld [vmem:[%s1237_s3 + $0x18] sm:$0xff]  ;;  %v40_v29 = vld [vmem:[%s1235_s1] sm:$0xff]  ;;  %v135_v30 = vld [vmem:[%s1237_s3 + $0x10] sm:$0xff] }
  0x12   :  { %637 = vmatpush3.msra.mxu0 %v47_v15  ;;  %668 = vmatpush3.msra.mxu1 %v142_v16  ;;  %v39_v31 = vld [vmem:[%s1234_s0] sm:$0x3]  ;;  %v134_v32 = vld [vmem:[%s1237_s3 + $0x8] sm:$0xff]  ;;  %v244_v34 = vld [vmem:[%s1239_s5 + $0x78] sm:$0xff] }
  0x13   :  { %638 = vmatprep.subr.mxu0 %v820_v1  ;;  %669 = vmatprep.subr.mxu1 %v820_v1  ;;  %v133_v33 = vld [vmem:[%s1237_s3] sm:$0xff]  ;;  %v243_v35 = vld [vmem:[%s1239_s5 + $0x70] sm:$0xff]  ;;  %v242_v36 = vld [vmem:[%s1239_s5 + $0x68] sm:$0xff] }
  0x14   :  { %639 = vmatpush3.msra.mxu0 %v46_v17  ;;  %670 = vmatpush3.msra.mxu1 %v141_v18  ;;  %v241_v37 = vld [vmem:[%s1239_s5 + $0x60] sm:$0xff]  ;;  %v240_v38 = vld [vmem:[%s1239_s5 + $0x58] sm:$0xff]  ;;  %v239_v39 = vld [vmem:[%s1239_s5 + $0x50] sm:$0xff] }
  0x15   :  { %640 = vmatprep.subr.mxu0 %v820_v1  ;;  %671 = vmatprep.subr.mxu1 %v820_v1  ;;  %v238_v40 = vld [vmem:[%s1239_s5 + $0x48] sm:$0xff]  ;;  %v237_v41 = vld [vmem:[%s1239_s5 + $0x40] sm:$0xff]  ;;  %v236_v42 = vld [vmem:[%s1239_s5 + $0x38] sm:$0xff] }
  0x16   :  { %641 = vmatpush3.msra.mxu0 %v45_v19  ;;  %672 = vmatpush3.msra.mxu1 %v140_v20  ;;  %v235_v43 = vld [vmem:[%s1239_s5 + $0x30] sm:$0xff]  ;;  %v234_v44 = vld [vmem:[%s1239_s5 + $0x28] sm:$0xff]  ;;  %v233_v45 = vld [vmem:[%s1239_s5 + $0x20] sm:$0xff] }
  0x17   :  { %642 = vmatprep.subr.mxu0 %v820_v1  ;;  %673 = vmatprep.subr.mxu1 %v820_v1  ;;  %v232_v46 = vld [vmem:[%s1239_s5 + $0x18] sm:$0xff]  ;;  %v530_v47 = vld [vmem:[%s1236_s2] ss:$0 sm:$0xff]  ;;  %v231_v51 = vld [vmem:[%s1239_s5 + $0x10] sm:$0xff] }
  0x18   :  { %643 = vmatpush3.msra.mxu0 %v44_v21  ;;  %674 = vmatpush3.msra.mxu1 %v139_v22  ;;  %v230_v52 = vld [vmem:[%s1239_s5 + $0x8] sm:$0xff]  ;;  %v229_v53 = vld [vmem:[%s1239_s5] sm:$0xff]  ;;  %v340_v54 = vld [vmem:[%s1241_s7 + $0x78] sm:$0xff] }
  0x19   :  { %644 = vmatprep.subr.mxu0 %v820_v1  ;;  %675 = vmatprep.subr.mxu1 %v820_v1  ;;  %v339_v55 = vld [vmem:[%s1241_s7 + $0x70] sm:$0xff]  ;;  %v338_v56 = vld [vmem:[%s1241_s7 + $0x68] sm:$0xff]  ;;  %v337_v57 = vld [vmem:[%s1241_s7 + $0x60] sm:$0xff] }
  0x1a   :  { %645 = vmatpush3.msra.mxu0 %v43_v23  ;;  %676 = vmatpush3.msra.mxu1 %v138_v24  ;;  %v336_v58 = vld [vmem:[%s1241_s7 + $0x58] sm:$0xff]  ;;  %v335_v59 = vld [vmem:[%s1241_s7 + $0x50] sm:$0xff]  ;;  %v334_v60 = vld [vmem:[%s1241_s7 + $0x48] sm:$0xff] }
  0x1b   :  { %646 = vmatprep.subr.mxu0 %v820_v1  ;;  %677 = vmatprep.subr.mxu1 %v820_v1  ;;  %v333_v61 = vld [vmem:[%s1241_s7 + $0x40] sm:$0xff]  ;;  %v332_v62 = vld [vmem:[%s1241_s7 + $0x38] sm:$0xff]  ;;  %v331_v63 = vld [vmem:[%s1241_s7 + $0x30] sm:$0xff] }
  0x1c   :  { %647 = vmatpush3.msra.mxu0 %v42_v25  ;;  %678 = vmatpush3.msra.mxu1 %v137_v26  ;;  %v330_v0 = vld [vmem:[%s1241_s7 + $0x28] sm:$0xff]  ;;  %v329_v2 = vld [vmem:[%s1241_s7 + $0x20] sm:$0xff]  ;;  %v328_v3 = vld [vmem:[%s1241_s7 + $0x18] sm:$0xff] }
  0x1d   :  { %648 = vmatprep.subr.mxu0 %v820_v1  ;;  %679 = vmatprep.subr.mxu1 %v820_v1  ;;  %v531_v4 = vld [vmem:[%s1238_s4] ss:$0 sm:$0xff]  ;;  %v327_v10 = vld [vmem:[%s1241_s7 + $0x10] sm:$0xff]  ;;  %v326_v11 = vld [vmem:[%s1241_s7 + $0x8] sm:$0xff] }
  0x1e   :  { %649 = vmatpush3.msra.mxu0 %v41_v27  ;;  %680 = vmatpush3.msra.mxu1 %v136_v28  ;;  %v325_v12 = vld [vmem:[%s1241_s7] sm:$0xff]  ;;  %v436_v13 = vld [vmem:[%s1243_s9 + $0x78] sm:$0xff]  ;;  %v435_v14 = vld [vmem:[%s1243_s9 + $0x70] sm:$0xff] }
  0x1f   :  { %650 = vmatprep.subr.mxu0 %v820_v1  ;;  %681 = vmatprep.subr.mxu1 %v820_v1  ;;  %v434_v15 = vld [vmem:[%s1243_s9 + $0x68] sm:$0xff]  ;;  %v433_v16 = vld [vmem:[%s1243_s9 + $0x60] sm:$0xff]  ;;  %v432_v17 = vld [vmem:[%s1243_s9 + $0x58] sm:$0xff] }
  0x20   :  { %651 = vmatpush3.msra.mxu0 %v40_v29  ;;  %682 = vmatpush3.msra.mxu1 %v135_v30  ;;  %v431_v18 = vld [vmem:[%s1243_s9 + $0x50] sm:$0xff]  ;;  %v430_v19 = vld [vmem:[%s1243_s9 + $0x48] sm:$0xff]  ;;  %v429_v20 = vld [vmem:[%s1243_s9 + $0x40] sm:$0xff] }
  0x21   :  { %653 = vmatmul.mubr.f32.vlgmr.msra.gmra.mxu0 %v39_v31  ;;  %683 = vmatprep.subr.mxu1 %v820_v1  ;;  %v428_v21 = vld [vmem:[%s1243_s9 + $0x38] sm:$0xff]  ;;  %v427_v22 = vld [vmem:[%s1243_s9 + $0x30] sm:$0xff]  ;;  %v426_v23 = vld [vmem:[%s1243_s9 + $0x28] sm:$0xff] }
  0x22   :  { %690 = vmatprep.subr.mxu0 %v820_v1  ;;  %722 = vmatprep.mubr.msk.f32.mxu0 %vm821_vm0, %v820_v1  ;;  %v425_v24 = vld [vmem:[%s1243_s9 + $0x20] sm:$0xff]  ;;  %v424_v25 = vld [vmem:[%s1243_s9 + $0x18] sm:$0xff] }
  0x23   :  { %684 = vmatpush3.msra.mxu1 %v134_v32  ;;  %691 = vmatpush3.msra.mxu0 %v244_v34  ;;  %v532_v26 = vld [vmem:[%s1240_s6] ss:$0 sm:$0xff]  ;;  %v423_v32 = vld [vmem:[%s1243_s9 + $0x10] sm:$0xff] }
  0x24   :  { %685 = vmatprep.subr.mxu1 %v820_v1  ;;  %692 = vmatprep.subr.mxu0 %v820_v1  ;;  %v421_v34 = vld [vmem:[%s1243_s9] sm:$0xff] }
  0x25   :  { %686 = vmatpush3.msra.mxu1 %v133_v33  ;;  %693 = vmatpush3.msra.mxu0 %v243_v35  ;;  %v422_v33 = vld [vmem:[%s1243_s9 + $0x8] sm:$0xff]  ;;  %v533_v35 = vld [vmem:[%s1242_s8] ss:$0 sm:$0xff]  ;;  %s522_s9 = sshll.u32 %s822_s30, 4  ;;  %s523_s9 = int_to_ptr.vmem [resolvable:$true] %s522_s9 }
  0x26   :  { %725 = vmatprep.subr.mxu1 %v820_v1  ;;  %694 = vmatprep.subr.mxu0 %v820_v1  ;;  %s798_s8 = scalar_lea.vmem %s523_s9, 32  ;;  %p803_p1 = scmp.lt.s32.totalorder %s523_s9, %s523_s9 }
  0x27   :  { %695 = vmatpush3.msra.mxu0 %v242_v36  ;;  %p799_p0 = scmp.ne.s32.totalorder %s523_s9, %s798_s8  ;;  %p804_p2 = scmp.lt.s32.totalorder %s798_s8, %s798_s8 }
  0x28   :  { %696 = vmatprep.subr.mxu0 %v820_v1 }
  0x29   :  { %697 = vmatpush3.msra.mxu0 %v241_v37  ;;  %p805_p3 = por %p804_p2, %p803_p1 }
  0x2a   :  { %698 = vmatprep.subr.mxu0 %v820_v1 }
  0x2b   :  { %699 = vmatpush3.msra.mxu0 %v240_v38  ;;  %p806_p4 = pnand %p805_p3, %p799_p0 }
  0x2c   :  { %700 = vmatprep.subr.mxu0 %v820_v1 }
  0x2d   :  { %701 = vmatpush3.msra.mxu0 %v239_v39 }
  0x2e   :  { %702 = vmatprep.subr.mxu0 %v820_v1 }
  0x2f   :  { %703 = vmatpush3.msra.mxu0 %v238_v40 }
  0x30   :  { %704 = vmatprep.subr.mxu0 %v820_v1 }
  0x31   :  { %705 = vmatpush3.msra.mxu0 %v237_v41  ;;  %v534_v41 = vld [vmem:[%s1244_s10] ss:$0 sm:$0xff] }
  0x32   :  { %706 = vmatprep.subr.mxu0 %v820_v1 }
  0x33   :  { %707 = vmatpush3.msra.mxu0 %v236_v42 }
  0x34   :  { %708 = vmatprep.subr.mxu0 %v820_v1 }
  0x35   :  { %709 = vmatpush3.msra.mxu0 %v235_v43 }
  0x36   :  { %710 = vmatprep.subr.mxu0 %v820_v1 }
  0x37   :  { %711 = vmatpush3.msra.mxu0 %v234_v44 }
  0x38   :  { %712 = vmatprep.subr.mxu0 %v820_v1 }
  0x39   :  { %713 = vmatpush3.msra.mxu0 %v233_v45 }
  0x3a   :  { %714 = vmatprep.subr.mxu0 %v820_v1 }
  0x3b   :  { %715 = vmatpush3.msra.mxu0 %v232_v46 }
  0x3c   :  { %716 = vmatprep.subr.mxu0 %v820_v1 }
  0x3d   :  { %717 = vmatpush3.msra.mxu0 %v231_v51 }
  0x3e   :  { %718 = vmatprep.subr.mxu0 %v820_v1 }
  0x3f   :  { %719 = vmatpush3.msra.mxu0 %v230_v52 }
  0x40   :  { %720 = vmatprep.subr.mxu0 %v820_v1 }
  0x41   :  { %721 = vmatpush3.msra.mxu0 %v229_v53 }
  0x42   :  { %760 = vmatprep.subr.mxu0 %v820_v1 }
  0xe1   :  { %v129_v48 = vpop.f32.mrf.mxu0 }
  0xe2   :  { %v130_v49 = vadd.f32 %v530_v47, %v129_v48 }
  0xe3   :  { %v654_v50 = vpop.f32.mrf.mxu0 }
  0xe4   :  { %688 = vmatmul.mubr.f32.vlgmr.msra.gmra.mxu1 %v130_v49 }
  0xe5   :  { %757 = vmatprep.mubr.msk.f32.mxu1 %vm821_vm0, %v820_v1  ;;  %726 = vmatpush3.msra.mxu1 %v340_v54 }
  0xe6   :  { %727 = vmatprep.subr.mxu1 %v820_v1 }
  0xe7   :  { %728 = vmatpush3.msra.mxu1 %v339_v55 }
  0xe8   :  { %729 = vmatprep.subr.mxu1 %v820_v1 }
  0xe9   :  { %730 = vmatpush3.msra.mxu1 %v338_v56 }
  0xea   :  { %731 = vmatprep.subr.mxu1 %v820_v1 }
  0xeb   :  { %732 = vmatpush3.msra.mxu1 %v337_v57 }
  0xec   :  { %733 = vmatprep.subr.mxu1 %v820_v1 }
  0xed   :  { %734 = vmatpush3.msra.mxu1 %v336_v58 }
  0xee   :  { %735 = vmatprep.subr.mxu1 %v820_v1 }
  0xef   :  { %736 = vmatpush3.msra.mxu1 %v335_v59 }
  0xf0   :  { %737 = vmatprep.subr.mxu1 %v820_v1 }
  0xf1   :  { %738 = vmatpush3.msra.mxu1 %v334_v60 }
  0xf2   :  { %739 = vmatprep.subr.mxu1 %v820_v1 }
  0xf3   :  { %740 = vmatpush3.msra.mxu1 %v333_v61 }
  0xf4   :  { %741 = vmatprep.subr.mxu1 %v820_v1 }
  0xf5   :  { %742 = vmatpush3.msra.mxu1 %v332_v62 }
  0xf6   :  { %743 = vmatprep.subr.mxu1 %v820_v1 }
  0xf7   :  { %744 = vmatpush3.msra.mxu1 %v331_v63 }
  0xf8   :  { %745 = vmatprep.subr.mxu1 %v820_v1 }
  0xf9   :  { %746 = vmatpush3.msra.mxu1 %v330_v0 }
  0xfa   :  { %747 = vmatprep.subr.mxu1 %v820_v1 }
  0xfb   :  { %748 = vmatpush3.msra.mxu1 %v329_v2 }
  0xfc   :  { %749 = vmatprep.subr.mxu1 %v820_v1 }
  0xfd   :  { %750 = vmatpush3.msra.mxu1 %v328_v3 }
  0xfe   :  { %751 = vmatprep.subr.mxu1 %v820_v1 }
  0xff   :  { %752 = vmatpush3.msra.mxu1 %v327_v10 }
 0x100   :  { %753 = vmatprep.subr.mxu1 %v820_v1 }
 0x101   :  { %754 = vmatpush3.msra.mxu1 %v326_v11 }
 0x102   :  { %755 = vmatprep.subr.mxu1 %v820_v1 }
 0x103   :  { %756 = vmatpush3.msra.mxu1 %v325_v12 }
 0x1a4   :  { %v222_v5 = vpop.f32.mrf.mxu1 }
 0x1a5   :  { %v223_v6 = vadd.f32 %v531_v4, %v222_v5 }
 0x1a6   :  { %v689_v7 = vpop.f32.mrf.mxu1 }
 0x1a7   :  { %vm226_vm1 = vcmp.gt.f32.partialorder %v223_v6, 0.0  ;;  %v227_v8 = vmul.f32 0.0, %v223_v6 }
 0x1a9   :  { %v228_v9 = vsel %vm226_vm1, %v223_v6, %v227_v8 }
 0x1aa   :  { %723 = vmatmul.mubr.f32.vlgmr.msra.gmra.mxu0 %v228_v9 }
 0x1ab   :  { %792 = vmatprep.mubr.msk.f32.mxu0 %vm821_vm0, %v820_v1  ;;  %761 = vmatpush3.msra.mxu0 %v436_v13 }
 0x1ac   :  { %762 = vmatprep.subr.mxu0 %v820_v1 }
 0x1ad   :  { %763 = vmatpush3.msra.mxu0 %v435_v14 }
 0x1ae   :  { %764 = vmatprep.subr.mxu0 %v820_v1 }
 0x1af   :  { %765 = vmatpush3.msra.mxu0 %v434_v15 }
 0x1b0   :  { %766 = vmatprep.subr.mxu0 %v820_v1 }
 0x1b1   :  { %767 = vmatpush3.msra.mxu0 %v433_v16 }
 0x1b2   :  { %768 = vmatprep.subr.mxu0 %v820_v1 }
 0x1b3   :  { %769 = vmatpush3.msra.mxu0 %v432_v17 }
 0x1b4   :  { %770 = vmatprep.subr.mxu0 %v820_v1 }
 0x1b5   :  { %771 = vmatpush3.msra.mxu0 %v431_v18 }
 0x1b6   :  { %772 = vmatprep.subr.mxu0 %v820_v1 }
 0x1b7   :  { %773 = vmatpush3.msra.mxu0 %v430_v19 }
 0x1b8   :  { %774 = vmatprep.subr.mxu0 %v820_v1 }
 0x1b9   :  { %775 = vmatpush3.msra.mxu0 %v429_v20 }
 0x1ba   :  { %776 = vmatprep.subr.mxu0 %v820_v1 }
 0x1bb   :  { %777 = vmatpush3.msra.mxu0 %v428_v21 }
 0x1bc   :  { %778 = vmatprep.subr.mxu0 %v820_v1 }
 0x1bd   :  { %779 = vmatpush3.msra.mxu0 %v427_v22 }
 0x1be   :  { %780 = vmatprep.subr.mxu0 %v820_v1 }
 0x1bf   :  { %781 = vmatpush3.msra.mxu0 %v426_v23 }
 0x1c0   :  { %782 = vmatprep.subr.mxu0 %v820_v1 }
 0x1c1   :  { %783 = vmatpush3.msra.mxu0 %v425_v24 }
 0x1c2   :  { %784 = vmatprep.subr.mxu0 %v820_v1 }
 0x1c3   :  { %785 = vmatpush3.msra.mxu0 %v424_v25 }
 0x1c4   :  { %786 = vmatprep.subr.mxu0 %v820_v1 }
 0x1c5   :  { %787 = vmatpush3.msra.mxu0 %v423_v32 }
 0x1c6   :  { %788 = vmatprep.subr.mxu0 %v820_v1 }
 0x1c7   :  { %789 = vmatpush3.msra.mxu0 %v422_v33 }
 0x1c8   :  { %790 = vmatprep.subr.mxu0 %v820_v1 }
 0x1c9   :  { %791 = vmatpush3.msra.mxu0 %v421_v34 }
 0x26a   :  { %v318_v27 = vpop.f32.mrf.mxu0 }
 0x26b   :  { %v319_v28 = vadd.f32 %v532_v26, %v318_v27 }
 0x26c   :  { %v724_v29 = vpop.f32.mrf.mxu0 }
 0x26d   :  { %vm322_vm2 = vcmp.gt.f32.partialorder %v319_v28, 0.0  ;;  %v323_v30 = vmul.f32 0.0, %v319_v28 }
 0x26f   :  { %v324_v31 = vsel %vm322_vm2, %v319_v28, %v323_v30 }
 0x270   :  { %758 = vmatmul.mubr.f32.vlgmr.msra.gmra.mxu1 %v324_v31 }
 0x330   :  { %v414_v36 = vpop.f32.mrf.mxu1 }
 0x331   :  { %v415_v37 = vadd.f32 %v533_v35, %v414_v36 }
 0x332   :  { %v759_v38 = vpop.f32.mrf.mxu1 }
 0x333   :  { %vm418_vm3 = vcmp.gt.f32.partialorder %v415_v37, 0.0  ;;  %v419_v39 = vmul.f32 0.0, %v415_v37 }
 0x335   :  { %v420_v40 = vsel %vm418_vm3, %v415_v37, %v419_v39 }
 0x336   :  { %793 = vmatmul.mubr.f32.vlgmr.msra.gmra.mxu0 %v420_v40 }
 0x3f6   :  { %v510_v42 = vpop.f32.mrf.mxu0 }
 0x3f7   :  { %v511_v1 = vadd.f32 %v534_v41, %v510_v42 }
 0x3f8   :  { %v794_v43 = vpop.f32.mrf.mxu0 }
 0x3f9   :  { %515 = vst.msk [vmem:[#allocation2] sm:$0x3] %vm514_vm4, %v511_v1 }
 0x3fa   :  { %809 = shalt.err (!%p806_p4)
}
 0x3fb   :  { %525 = dma.vmem_to_hbm [thread:$0]  %s523_s9, 32, %s1245_s11, [#allocation3]  }
 0x3fc   :  { %818 = dma.done.wait [#allocation3], 32  }
 0x3fd   :  { %819 = vsyncadd [#allocation3], 4294967264 }
 0x3fe   :  { %529 = vsyncpa [#allocation3], 1 }

</bundles_post_ra>
